<compile_context>
chip_gen: v6e
topology: v6e:2x2x1
jax: 0.10.0
libtpu: 0.0.40
codegen_flags: <defaults>
</compile_context>

<pallas_src>
import functools

import jax
import jax.numpy as jnp
from jax import lax
from jax.experimental import pallas as pl
from jax.experimental.pallas import tpu as pltpu


# ----------------------------------------------------------------------------
# Helpers
# ----------------------------------------------------------------------------

def _round_up(x, m):
    return ((x + m - 1) // m) * m


def _pad2(x, rows, cols):
    r, c = x.shape
    return jnp.pad(x, ((0, rows - r), (0, cols - c)))


# ----------------------------------------------------------------------------
# Fused Pallas kernel: one grid step == one batch element
# ----------------------------------------------------------------------------

def _attn_cnp_kernel(xy_ref, xall_ref, wfront_ref, wsq_ref, ball_ref,
                     wqkv_ref, bqkv_ref, woh_ref, whead_ref, o_ref,
                     *, Nt, num_heads, n_enc_hidden, n_dec_hidden):
    f32 = jnp.float32

    def mm(x, w):
        return jnp.dot(x, w, preferred_element_type=f32,
                       precision=lax.Precision.DEFAULT)

    ne, nd = n_enc_hidden, n_dec_hidden
    # bias-stack row indices (see packing order in the wrapper)
    b_enc0 = 0
    b_enc_out = 1 + ne
    b_xe = 2 + ne
    b_dec0 = 3 + ne
    b_o = 4 + ne + nd

    xy = xy_ref[...]                  # (Nc, Pf)   [X_context | y_context], lane-padded
    x_all = xall_ref[...]             # (Nt+Nc, Pf) [X_target ; X_context], lane-padded

    # ---- encoder MLP over context points ------------------------------------
    h = jnp.maximum(mm(xy, wfront_ref[0]) + ball_ref[b_enc0], 0.0)
    sq = 0
    for i in range(ne):
        h = jnp.maximum(mm(h, wsq_ref[sq]) + ball_ref[1 + i], 0.0)
        sq += 1
    r = mm(h, wsq_ref[sq]) + ball_ref[b_enc_out]          # (Nc, W)
    sq += 1

    # ---- x_encoder applied to [targets; context] with one matmul ------------
    x_all_enc = mm(x_all, wfront_ref[1]) + ball_ref[b_xe]  # (Nt+Nc, W)
    xt_enc = x_all_enc[:Nt]                                # (Nt, W)
    xc_enc = x_all_enc[Nt:]                                # (Nc, W)

    # ---- multi-head cross-attention (q=targets, k=context, v=r) -------------
    # Per-head weights on a leading axis (no lane-offset activation slices);
    # 1/sqrt(dh) already folded into the q weights/bias by the wrapper.
    H = num_heads
    acc = jnp.zeros((Nt, xt_enc.shape[-1]), f32)
    for hi in range(H):
        qh = mm(xt_enc, wqkv_ref[hi]) + bqkv_ref[hi]              # (Nt, dh)
        kh = mm(xc_enc, wqkv_ref[H + hi]) + bqkv_ref[H + hi]      # (Nc, dh)
        vh = mm(r, wqkv_ref[2 * H + hi]) + bqkv_ref[2 * H + hi]   # (Nc, dh)
        s = lax.dot_general(qh, kh, (((1,), (1,)), ((), ())),
                            precision=lax.Precision.DEFAULT,
                            preferred_element_type=f32)           # (Nt, Nc)
        s = s - jnp.max(s, axis=-1, keepdims=True)
        p = jnp.exp(s)
        p = p / jnp.sum(p, axis=-1, keepdims=True)                # exact softmax
        ah = mm(p, vh)                                            # (Nt, dh)
        # out-projection folded per head: cat(heads) @ Wo == sum_h head_h @ Wo_h
        acc = acc + mm(ah, woh_ref[hi])                           # (Nt, W)
    r_attn = acc + ball_ref[b_o]

    # ---- decoder MLP + fused mean|logvar head (lane-dense, bias as last row) -
    xt = x_all[:Nt]                                        # (Nt, Pf) raw targets
    h = jnp.maximum(mm(r_attn, wsq_ref[sq]) + mm(xt, wfront_ref[2])
                    + ball_ref[b_dec0], 0.0)
    sq += 1
    for i in range(nd):
        h = jnp.maximum(mm(h, wsq_ref[sq]) + ball_ref[4 + ne + i], 0.0)
        sq += 1

    whead = whead_ref[...]                                 # (W+1, OutP)
    Wd = whead.shape[0] - 1
    o_ref[...] = (mm(h, whead[:Wd]) + whead[Wd:Wd + 1]).astype(o_ref.dtype)


# ----------------------------------------------------------------------------
# Wrapper: weight packing + pallas_call
# ----------------------------------------------------------------------------

@functools.partial(jax.jit, static_argnames=("num_heads",))
def attn_cnp_forward(params, X_context, y_context, X_target, num_heads=4):
    """Pallas-fused AttnCNP forward. Returns (mean, logvar), each (B, Nt, output_dim)."""
    f32 = jnp.float32
    B, Nc, din = X_context.shape
    dout = y_context.shape[-1]
    Nt = X_target.shape[1]
    hidden = params["enc_mlp"][0][0].shape[1]
    latent = params["enc_out"][0].shape[1]
    ne = len(params["enc_mlp"]) - 1
    nd = len(params["dec_mlp"]) - 1
    W = max(hidden, latent)
    dh = latent // num_heads
    Pf = _round_up(din + dout, 8)            # padded small-input width
    OutP = _round_up(2 * dout, 128)          # lane-dense output width

    # --- activations: wrapper-side concat + lane pad (no in-kernel concats) ---
    xy = jnp.concatenate([X_context, y_context], axis=-1).astype(f32)
    xy_p = jnp.pad(xy, ((0, 0), (0, 0), (0, Pf - (din + dout))))
    x_all = jnp.concatenate([X_target, X_context], axis=1).astype(f32)
    xall_p = jnp.pad(x_all, ((0, 0), (0, 0), (0, Pf - din)))

    # --- small-input-dim weights, stacked: [enc0 | x_enc | dec0_x] ------------
    w_enc0, b_enc0 = params["enc_mlp"][0]
    w_xe, b_xe = params["x_enc"]
    w_dec0, b_dec0 = params["dec_mlp"][0]                  # (latent+din, hidden)
    wfront = jnp.stack([_pad2(w_enc0, Pf, W),
                        _pad2(w_xe, Pf, W),
                        _pad2(w_dec0[latent:], Pf, W)])    # (3, Pf, W)

    # --- square weight stack: enc hidden..., enc_out, dec0_r, dec hidden... ---
    sq = [_pad2(w, W, W) for w, _ in params["enc_mlp"][1:]]
    sq.append(_pad2(params["enc_out"][0], W, W))
    sq.append(_pad2(w_dec0[:latent], W, W))
    sq += [_pad2(w, W, W) for w, _ in params["dec_mlp"][1:]]
    wsq = jnp.stack(sq)                                    # (ne+nd+2, W, W)

    # --- bias stack (order must match the kernel's index bookkeeping) ---------
    bs = ([b_enc0] + [b for _, b in params["enc_mlp"][1:]]
          + [params["enc_out"][1], b_xe, b_dec0]
          + [b for _, b in params["dec_mlp"][1:]] + [params["bo"]])
    b_all = jnp.stack([_pad2(b, 1, W) for b in bs])        # (ne+nd+5, 1, W)

    # --- attention weights pre-split per head; scale folded into q ------------
    scale = 1.0 / float(dh) ** 0.5

    def heads_in(w):   # (latent, latent) -> (H, W, dh)
        w = w.reshape(latent, num_heads, dh).transpose(1, 0, 2)
        return jnp.pad(w, ((0, 0), (0, W - latent), (0, 0)))

    def heads_b(b):    # (1, latent) -> (H, 1, dh)
        return b.reshape(1, num_heads, dh).transpose(1, 0, 2)

    wqkv = jnp.concatenate([heads_in(params["wq"] * scale),
                            heads_in(params["wk"]),
                            heads_in(params["wv"])], axis=0)        # (3H, W, dh)
    bqkv = jnp.concatenate([heads_b(params["bq"] * scale),
                            heads_b(params["bk"]),
                            heads_b(params["bv"])], axis=0)         # (3H, 1, dh)
    woh = jnp.pad(params["wo"].reshape(num_heads, dh, latent),
                  ((0, 0), (0, 0), (0, W - latent)))                # (H, dh, W)

    # --- fused, lane-dense mean|logvar head with bias as the last row ---------
    w_head = jnp.concatenate([params["mean_head"][0], params["logvar_head"][0]], axis=1)
    b_head = jnp.concatenate([params["mean_head"][1], params["logvar_head"][1]], axis=1)
    whead_aug = jnp.concatenate([_pad2(w_head, W, OutP),
                                 _pad2(b_head, 1, OutP)], axis=0)   # (W+1, OutP)

    weight_args = [wfront, wsq, b_all, wqkv, bqkv, woh, whead_aug]

    kernel = functools.partial(_attn_cnp_kernel, Nt=Nt, num_heads=num_heads,
                               n_enc_hidden=ne, n_dec_hidden=nd)

    def resident(a):   # weights: same block every grid step -> fetched once
        n = a.ndim
        return pl.BlockSpec(a.shape, lambda b, n=n: (0,) * n)

    out = pl.pallas_call(
        kernel,
        grid=(B,),
        out_shape=jax.ShapeDtypeStruct((B, Nt, OutP), f32),
        in_specs=[pl.BlockSpec((None, Nc, Pf), lambda b: (b, 0, 0)),
                  pl.BlockSpec((None, Nt + Nc, Pf), lambda b: (b, 0, 0))]
                 + [resident(a) for a in weight_args],
        out_specs=pl.BlockSpec((None, Nt, OutP), lambda b: (b, 0, 0)),
        compiler_params=pltpu.CompilerParams(
            dimension_semantics=("parallel",)),
    )(xy_p, xall_p, *weight_args)

    mean = out[:, :, :dout]
    logvar = out[:, :, dout:2 * dout]
    return mean, logvar


# ----------------------------------------------------------------------------
# Parameter init (deterministic, synthetic)
# ----------------------------------------------------------------------------

def _init_linear(key, d_in, d_out, scale=0.1):
    kw, kb = jax.random.split(key)
    w = scale * jax.random.normal(kw, (d_in, d_out), jnp.float32)
    b = scale * jax.random.normal(kb, (1, d_out), jnp.float32)
    return w, b


def init_params(key, input_dim, output_dim, hidden_dim, latent_dim,
                hidden_layers_enc, hidden_layers_dec):
    keys = iter(jax.random.split(key, 64))
    p = {}
    p["enc_mlp"] = [_init_linear(next(keys), input_dim + output_dim, hidden_dim)]
    for _ in range(hidden_layers_enc):
        p["enc_mlp"].append(_init_linear(next(keys), hidden_dim, hidden_dim))
    p["enc_out"] = _init_linear(next(keys), hidden_dim, latent_dim)
    p["x_enc"] = _init_linear(next(keys), input_dim, latent_dim)
    p["wq"], p["bq"] = _init_linear(next(keys), latent_dim, latent_dim)
    p["wk"], p["bk"] = _init_linear(next(keys), latent_dim, latent_dim)
    p["wv"], p["bv"] = _init_linear(next(keys), latent_dim, latent_dim)
    p["wo"], p["bo"] = _init_linear(next(keys), latent_dim, latent_dim)
    p["dec_mlp"] = [_init_linear(next(keys), latent_dim + input_dim, hidden_dim)]
    for _ in range(hidden_layers_dec):
        p["dec_mlp"].append(_init_linear(next(keys), hidden_dim, hidden_dim))
    p["mean_head"] = _init_linear(next(keys), hidden_dim, output_dim)
    p["logvar_head"] = _init_linear(next(keys), hidden_dim, output_dim)
    return p


# ----------------------------------------------------------------------------
# Pure-JAX reference (mirrors the PyTorch module); full-f32 matmuls, scoped only here
# ----------------------------------------------------------------------------

def attn_cnp_reference(params, X_context, y_context, X_target, num_heads=4):
    with jax.default_matmul_precision("highest"):
        B, Nc, _ = X_context.shape
        Nt = X_target.shape[1]
        latent = params["enc_out"][0].shape[1]
        dh = latent // num_heads

        def lin(x, wb, act=False):
            w, b = wb
            y = x @ w + b
            return jnp.maximum(y, 0.0) if act else y

        h = jnp.concatenate([X_context, y_context], axis=-1)
        for wb in params["enc_mlp"]:
            h = lin(h, wb, act=True)
        r = lin(h, params["enc_out"])
        xt_enc = lin(X_target, params["x_enc"])
        xc_enc = lin(X_context, params["x_enc"])

        qp = xt_enc @ params["wq"] + params["bq"]
        kp = xc_enc @ params["wk"] + params["bk"]
        vp = r @ params["wv"] + params["bv"]

        def heads(x, n):
            return x.reshape(B, n, num_heads, dh).transpose(0, 2, 1, 3)

        q = heads(qp, Nt) * (1.0 / float(dh) ** 0.5)
        k = heads(kp, Nc)
        v = heads(vp, Nc)
        s = jnp.einsum("bhqd,bhkd->bhqk", q, k)
        p = jax.nn.softmax(s, axis=-1)
        a = jnp.einsum("bhqk,bhkd->bhqd", p, v)
        a = a.transpose(0, 2, 1, 3).reshape(B, Nt, latent)
        r_attn = a @ params["wo"] + params["bo"]

        h = jnp.concatenate([r_attn, X_target], axis=-1)
        for wb in params["dec_mlp"]:
            h = lin(h, wb, act=True)
        mean = lin(h, params["mean_head"])
        logvar = lin(h, params["logvar_head"])
        return mean, logvar


# ----------------------------------------------------------------------------
# Main
# ----------------------------------------------------------------------------

if __name__ == "__main__":
    B, Nc, Nt = 2, 8, 8
    input_dim, output_dim = 4, 2
    hidden_dim, latent_dim = 32, 32          # latent divisible by num_heads=4
    hidden_layers_enc, hidden_layers_dec = 2, 2

    key = jax.random.PRNGKey(0)
    kp, kx, ky, kt = jax.random.split(key, 4)

    params = init_params(kp, input_dim, output_dim, hidden_dim, latent_dim,
                         hidden_layers_enc, hidden_layers_dec)

    X_context = jax.random.normal(kx, (B, Nc, input_dim), jnp.float32)
    y_context = jax.random.normal(ky, (B, Nc, output_dim), jnp.float32)
    X_target = jax.random.normal(kt, (B, Nt, input_dim), jnp.float32)

    mean, logvar = attn_cnp_forward(params, X_context, y_context, X_target)
    jax.block_until_ready((mean, logvar))

    assert mean.shape == (B, Nt, output_dim)
    assert logvar.shape == (B, Nt, output_dim)

    # Numerics check. Softmax is exact now; remaining difference is only the kernel's
    # DEFAULT-precision (single-pass) MXU matmuls vs. the full-f32 reference.
    mean_ref, logvar_ref = attn_cnp_reference(params, X_context, y_context, X_target)
    assert bool(jnp.allclose(mean, mean_ref, atol=1e-2, rtol=1e-2))
    assert bool(jnp.allclose(logvar, logvar_ref, atol=1e-2, rtol=1e-2))

    print("KERNEL_OK")
</pallas_src>

<mosaic_0001>
module attributes {stable_mosaic.version = 11 : i64} {
  func.func @_attn_cnp_kernel(%arg0: i32, %arg1: memref<1x8x8xf32, #tpu.memory_space<vmem>>, %arg2: memref<1x16x8xf32, #tpu.memory_space<vmem>>, %arg3: memref<3x8x32xf32, #tpu.memory_space<vmem>>, %arg4: memref<6x32x32xf32, #tpu.memory_space<vmem>>, %arg5: memref<9x1x32xf32, #tpu.memory_space<vmem>>, %arg6: memref<12x32x8xf32, #tpu.memory_space<vmem>>, %arg7: memref<12x1x8xf32, #tpu.memory_space<vmem>>, %arg8: memref<4x8x32xf32, #tpu.memory_space<vmem>>, %arg9: memref<33x128xf32, #tpu.memory_space<vmem>>, %arg10: memref<1x8x128xf32, #tpu.memory_space<vmem>>) attributes {dimension_semantics = [#tpu.dimension_semantics<parallel>], iteration_bounds = array<i64: 2>, scalar_prefetch = 0 : i64, scratch_operands = 0 : i64, tpu.core_type = #tpu.core_type<tc>, window_params = [{transform_indices = @transform_0, window_bounds = array<i64: 1, 8, 8>}, {transform_indices = @transform_1, window_bounds = array<i64: 1, 16, 8>}, {pipeline_mode = #tpu.pipeline_mode<synchronous>, transform_indices = @transform_2, window_bounds = array<i64: 3, 8, 32>}, {pipeline_mode = #tpu.pipeline_mode<synchronous>, transform_indices = @transform_3, window_bounds = array<i64: 6, 32, 32>}, {pipeline_mode = #tpu.pipeline_mode<synchronous>, transform_indices = @transform_4, window_bounds = array<i64: 9, 1, 32>}, {pipeline_mode = #tpu.pipeline_mode<synchronous>, transform_indices = @transform_5, window_bounds = array<i64: 12, 32, 8>}, {pipeline_mode = #tpu.pipeline_mode<synchronous>, transform_indices = @transform_6, window_bounds = array<i64: 12, 1, 8>}, {pipeline_mode = #tpu.pipeline_mode<synchronous>, transform_indices = @transform_7, window_bounds = array<i64: 4, 8, 32>}, {pipeline_mode = #tpu.pipeline_mode<synchronous>, transform_indices = @transform_8, window_bounds = array<i64: 33, 128>}, {transform_indices = @transform_9, window_bounds = array<i64: 1, 8, 128>}]} {
    %c0 = arith.constant 0 : index
    %c0_0 = arith.constant 0 : index
    %c0_1 = arith.constant 0 : index
    %0 = vector.load %arg1[%c0, %c0_0, %c0_1] : memref<1x8x8xf32, #tpu.memory_space<vmem>>, vector<1x8x8xf32>
    %1 = vector.shape_cast %0 : vector<1x8x8xf32> to vector<8x8xf32>
    %c0_2 = arith.constant 0 : index
    %c0_3 = arith.constant 0 : index
    %c0_4 = arith.constant 0 : index
    %2 = vector.load %arg2[%c0_2, %c0_3, %c0_4] : memref<1x16x8xf32, #tpu.memory_space<vmem>>, vector<1x16x8xf32>
    %3 = vector.shape_cast %2 : vector<1x16x8xf32> to vector<16x8xf32>
    %c0_5 = arith.constant 0 : index
    %c0_6 = arith.constant 0 : index
    %c0_7 = arith.constant 0 : index
    %4 = vector.load %arg3[%c0_5, %c0_6, %c0_7] : memref<3x8x32xf32, #tpu.memory_space<vmem>>, vector<1x8x32xf32>
    %5 = vector.shape_cast %4 : vector<1x8x32xf32> to vector<8x32xf32>
    %cst = arith.constant dense<0.000000e+00> : vector<8x32xf32>
    %6 = tpu.matmul %1, %5, %cst {dimension_numbers = #tpu.dot_dimension_numbers<[1], [0], [0], [1], [0, 0, 1, 1], [], []>} : vector<8x8xf32>, vector<8x32xf32>, vector<8x32xf32> -> vector<8x32xf32>
    %c0_8 = arith.constant 0 : index
    %c0_9 = arith.constant 0 : index
    %c0_10 = arith.constant 0 : index
    %7 = vector.load %arg5[%c0_8, %c0_9, %c0_10] : memref<9x1x32xf32, #tpu.memory_space<vmem>>, vector<1x1x32xf32>
    %8 = vector.shape_cast %7 : vector<1x1x32xf32> to vector<1x32xf32>
    %9 = vector.broadcast %8 : vector<1x32xf32> to vector<8x32xf32>
    %10 = arith.addf %6, %9 : vector<8x32xf32>
    %cst_11 = arith.constant 0.000000e+00 : f32
    %11 = vector.broadcast %cst_11 : f32 to vector<8x32xf32>
    %12 = arith.maximumf %10, %11 : vector<8x32xf32>
    %c0_12 = arith.constant 0 : index
    %c0_13 = arith.constant 0 : index
    %c0_14 = arith.constant 0 : index
    %13 = vector.load %arg4[%c0_12, %c0_13, %c0_14] : memref<6x32x32xf32, #tpu.memory_space<vmem>>, vector<1x32x32xf32>
    %14 = vector.shape_cast %13 : vector<1x32x32xf32> to vector<32x32xf32>
    %cst_15 = arith.constant dense<0.000000e+00> : vector<8x32xf32>
    %15 = tpu.matmul %12, %14, %cst_15 {dimension_numbers = #tpu.dot_dimension_numbers<[1], [0], [0], [1], [0, 0, 1, 1], [], []>} : vector<8x32xf32>, vector<32x32xf32>, vector<8x32xf32> -> vector<8x32xf32>
    %c1 = arith.constant 1 : index
    %c0_16 = arith.constant 0 : index
    %c0_17 = arith.constant 0 : index
    %16 = vector.load %arg5[%c1, %c0_16, %c0_17] : memref<9x1x32xf32, #tpu.memory_space<vmem>>, vector<1x1x32xf32>
    %17 = vector.shape_cast %16 : vector<1x1x32xf32> to vector<1x32xf32>
    %18 = vector.broadcast %17 : vector<1x32xf32> to vector<8x32xf32>
    %19 = arith.addf %15, %18 : vector<8x32xf32>
    %cst_18 = arith.constant 0.000000e+00 : f32
    %20 = vector.broadcast %cst_18 : f32 to vector<8x32xf32>
    %21 = arith.maximumf %19, %20 : vector<8x32xf32>
    %c1_19 = arith.constant 1 : index
    %c0_20 = arith.constant 0 : index
    %c0_21 = arith.constant 0 : index
    %22 = vector.load %arg4[%c1_19, %c0_20, %c0_21] : memref<6x32x32xf32, #tpu.memory_space<vmem>>, vector<1x32x32xf32>
    %23 = vector.shape_cast %22 : vector<1x32x32xf32> to vector<32x32xf32>
    %cst_22 = arith.constant dense<0.000000e+00> : vector<8x32xf32>
    %24 = tpu.matmul %21, %23, %cst_22 {dimension_numbers = #tpu.dot_dimension_numbers<[1], [0], [0], [1], [0, 0, 1, 1], [], []>} : vector<8x32xf32>, vector<32x32xf32>, vector<8x32xf32> -> vector<8x32xf32>
    %c2 = arith.constant 2 : index
    %c0_23 = arith.constant 0 : index
    %c0_24 = arith.constant 0 : index
    %25 = vector.load %arg5[%c2, %c0_23, %c0_24] : memref<9x1x32xf32, #tpu.memory_space<vmem>>, vector<1x1x32xf32>
    %26 = vector.shape_cast %25 : vector<1x1x32xf32> to vector<1x32xf32>
    %27 = vector.broadcast %26 : vector<1x32xf32> to vector<8x32xf32>
    %28 = arith.addf %24, %27 : vector<8x32xf32>
    %cst_25 = arith.constant 0.000000e+00 : f32
    %29 = vector.broadcast %cst_25 : f32 to vector<8x32xf32>
    %30 = arith.maximumf %28, %29 : vector<8x32xf32>
    %c2_26 = arith.constant 2 : index
    %c0_27 = arith.constant 0 : index
    %c0_28 = arith.constant 0 : index
    %31 = vector.load %arg4[%c2_26, %c0_27, %c0_28] : memref<6x32x32xf32, #tpu.memory_space<vmem>>, vector<1x32x32xf32>
    %32 = vector.shape_cast %31 : vector<1x32x32xf32> to vector<32x32xf32>
    %cst_29 = arith.constant dense<0.000000e+00> : vector<8x32xf32>
    %33 = tpu.matmul %30, %32, %cst_29 {dimension_numbers = #tpu.dot_dimension_numbers<[1], [0], [0], [1], [0, 0, 1, 1], [], []>} : vector<8x32xf32>, vector<32x32xf32>, vector<8x32xf32> -> vector<8x32xf32>
    %c3 = arith.constant 3 : index
    %c0_30 = arith.constant 0 : index
    %c0_31 = arith.constant 0 : index
    %34 = vector.load %arg5[%c3, %c0_30, %c0_31] : memref<9x1x32xf32, #tpu.memory_space<vmem>>, vector<1x1x32xf32>
    %35 = vector.shape_cast %34 : vector<1x1x32xf32> to vector<1x32xf32>
    %36 = vector.broadcast %35 : vector<1x32xf32> to vector<8x32xf32>
    %37 = arith.addf %33, %36 : vector<8x32xf32>
    %c1_32 = arith.constant 1 : index
    %c0_33 = arith.constant 0 : index
    %c0_34 = arith.constant 0 : index
    %38 = vector.load %arg3[%c1_32, %c0_33, %c0_34] : memref<3x8x32xf32, #tpu.memory_space<vmem>>, vector<1x8x32xf32>
    %39 = vector.shape_cast %38 : vector<1x8x32xf32> to vector<8x32xf32>
    %cst_35 = arith.constant dense<0.000000e+00> : vector<16x32xf32>
    %40 = tpu.matmul %3, %39, %cst_35 {dimension_numbers = #tpu.dot_dimension_numbers<[1], [0], [0], [1], [0, 0, 1, 1], [], []>} : vector<16x8xf32>, vector<8x32xf32>, vector<16x32xf32> -> vector<16x32xf32>
    %c4 = arith.constant 4 : index
    %c0_36 = arith.constant 0 : index
    %c0_37 = arith.constant 0 : index
    %41 = vector.load %arg5[%c4, %c0_36, %c0_37] : memref<9x1x32xf32, #tpu.memory_space<vmem>>, vector<1x1x32xf32>
    %42 = vector.shape_cast %41 : vector<1x1x32xf32> to vector<1x32xf32>
    %43 = vector.broadcast %42 : vector<1x32xf32> to vector<16x32xf32>
    %44 = arith.addf %40, %43 : vector<16x32xf32>
    %45 = vector.extract_strided_slice %44 {offsets = [0, 0], sizes = [8, 32], strides = [1, 1]} : vector<16x32xf32> to vector<8x32xf32>
    %46 = vector.extract_strided_slice %44 {offsets = [8, 0], sizes = [8, 32], strides = [1, 1]} : vector<16x32xf32> to vector<8x32xf32>
    %cst_38 = arith.constant 0.000000e+00 : f32
    %47 = vector.broadcast %cst_38 : f32 to vector<8x32xf32>
    %c0_39 = arith.constant 0 : index
    %c0_40 = arith.constant 0 : index
    %c0_41 = arith.constant 0 : index
    %48 = vector.load %arg6[%c0_39, %c0_40, %c0_41] : memref<12x32x8xf32, #tpu.memory_space<vmem>>, vector<1x32x8xf32>
    %49 = vector.shape_cast %48 : vector<1x32x8xf32> to vector<32x8xf32>
    %cst_42 = arith.constant dense<0.000000e+00> : vector<8x8xf32>
    %50 = tpu.matmul %45, %49, %cst_42 {dimension_numbers = #tpu.dot_dimension_numbers<[1], [0], [0], [1], [0, 0, 1, 1], [], []>} : vector<8x32xf32>, vector<32x8xf32>, vector<8x8xf32> -> vector<8x8xf32>
    %c0_43 = arith.constant 0 : index
    %c0_44 = arith.constant 0 : index
    %c0_45 = arith.constant 0 : index
    %51 = vector.load %arg7[%c0_43, %c0_44, %c0_45] : memref<12x1x8xf32, #tpu.memory_space<vmem>>, vector<1x1x8xf32>
    %52 = vector.shape_cast %51 : vector<1x1x8xf32> to vector<1x8xf32>
    %53 = vector.broadcast %52 : vector<1x8xf32> to vector<8x8xf32>
    %54 = arith.addf %50, %53 : vector<8x8xf32>
    %c4_46 = arith.constant 4 : index
    %c0_47 = arith.constant 0 : index
    %c0_48 = arith.constant 0 : index
    %55 = vector.load %arg6[%c4_46, %c0_47, %c0_48] : memref<12x32x8xf32, #tpu.memory_space<vmem>>, vector<1x32x8xf32>
    %56 = vector.shape_cast %55 : vector<1x32x8xf32> to vector<32x8xf32>
    %cst_49 = arith.constant dense<0.000000e+00> : vector<8x8xf32>
    %57 = tpu.matmul %46, %56, %cst_49 {dimension_numbers = #tpu.dot_dimension_numbers<[1], [0], [0], [1], [0, 0, 1, 1], [], []>} : vector<8x32xf32>, vector<32x8xf32>, vector<8x8xf32> -> vector<8x8xf32>
    %c4_50 = arith.constant 4 : index
    %c0_51 = arith.constant 0 : index
    %c0_52 = arith.constant 0 : index
    %58 = vector.load %arg7[%c4_50, %c0_51, %c0_52] : memref<12x1x8xf32, #tpu.memory_space<vmem>>, vector<1x1x8xf32>
    %59 = vector.shape_cast %58 : vector<1x1x8xf32> to vector<1x8xf32>
    %60 = vector.broadcast %59 : vector<1x8xf32> to vector<8x8xf32>
    %61 = arith.addf %57, %60 : vector<8x8xf32>
    %c8 = arith.constant 8 : index
    %c0_53 = arith.constant 0 : index
    %c0_54 = arith.constant 0 : index
    %62 = vector.load %arg6[%c8, %c0_53, %c0_54] : memref<12x32x8xf32, #tpu.memory_space<vmem>>, vector<1x32x8xf32>
    %63 = vector.shape_cast %62 : vector<1x32x8xf32> to vector<32x8xf32>
    %cst_55 = arith.constant dense<0.000000e+00> : vector<8x8xf32>
    %64 = tpu.matmul %37, %63, %cst_55 {dimension_numbers = #tpu.dot_dimension_numbers<[1], [0], [0], [1], [0, 0, 1, 1], [], []>} : vector<8x32xf32>, vector<32x8xf32>, vector<8x8xf32> -> vector<8x8xf32>
    %c8_56 = arith.constant 8 : index
    %c0_57 = arith.constant 0 : index
    %c0_58 = arith.constant 0 : index
    %65 = vector.load %arg7[%c8_56, %c0_57, %c0_58] : memref<12x1x8xf32, #tpu.memory_space<vmem>>, vector<1x1x8xf32>
    %66 = vector.shape_cast %65 : vector<1x1x8xf32> to vector<1x8xf32>
    %67 = vector.broadcast %66 : vector<1x8xf32> to vector<8x8xf32>
    %68 = arith.addf %64, %67 : vector<8x8xf32>
    %cst_59 = arith.constant dense<0.000000e+00> : vector<8x8xf32>
    %69 = tpu.matmul %54, %61, %cst_59 {dimension_numbers = #tpu.dot_dimension_numbers<[1], [1], [0], [0], [0, 0, 1, 0], [], []>} : vector<8x8xf32>, vector<8x8xf32>, vector<8x8xf32> -> vector<8x8xf32>
    %cst_60 = arith.constant dense<0xFF800000> : vector<8xf32>
    %70 = vector.multi_reduction <maximumf>, %69, %cst_60 [1] : vector<8x8xf32> to vector<8xf32>
    %71 = vector.shape_cast %70 : vector<8xf32> to vector<8x1xf32>
    %72 = vector.broadcast %71 : vector<8x1xf32> to vector<8x8xf32>
    %73 = arith.subf %69, %72 : vector<8x8xf32>
    %74 = math.exp %73 : vector<8x8xf32>
    %cst_61 = arith.constant dense<0.000000e+00> : vector<8xf32>
    %75 = vector.multi_reduction <add>, %74, %cst_61 [1] : vector<8x8xf32> to vector<8xf32>
    %76 = vector.shape_cast %75 : vector<8xf32> to vector<8x1xf32>
    %77 = vector.broadcast %76 : vector<8x1xf32> to vector<8x8xf32>
    %78 = arith.divf %74, %77 : vector<8x8xf32>
    %cst_62 = arith.constant dense<0.000000e+00> : vector<8x8xf32>
    %79 = tpu.matmul %78, %68, %cst_62 {dimension_numbers = #tpu.dot_dimension_numbers<[1], [0], [0], [1], [0, 0, 1, 1], [], []>} : vector<8x8xf32>, vector<8x8xf32>, vector<8x8xf32> -> vector<8x8xf32>
    %c0_63 = arith.constant 0 : index
    %c0_64 = arith.constant 0 : index
    %c0_65 = arith.constant 0 : index
    %80 = vector.load %arg8[%c0_63, %c0_64, %c0_65] : memref<4x8x32xf32, #tpu.memory_space<vmem>>, vector<1x8x32xf32>
    %81 = vector.shape_cast %80 : vector<1x8x32xf32> to vector<8x32xf32>
    %cst_66 = arith.constant dense<0.000000e+00> : vector<8x32xf32>
    %82 = tpu.matmul %79, %81, %cst_66 {dimension_numbers = #tpu.dot_dimension_numbers<[1], [0], [0], [1], [0, 0, 1, 1], [], []>} : vector<8x8xf32>, vector<8x32xf32>, vector<8x32xf32> -> vector<8x32xf32>
    %83 = arith.addf %47, %82 : vector<8x32xf32>
    %c1_67 = arith.constant 1 : index
    %c0_68 = arith.constant 0 : index
    %c0_69 = arith.constant 0 : index
    %84 = vector.load %arg6[%c1_67, %c0_68, %c0_69] : memref<12x32x8xf32, #tpu.memory_space<vmem>>, vector<1x32x8xf32>
    %85 = vector.shape_cast %84 : vector<1x32x8xf32> to vector<32x8xf32>
    %cst_70 = arith.constant dense<0.000000e+00> : vector<8x8xf32>
    %86 = tpu.matmul %45, %85, %cst_70 {dimension_numbers = #tpu.dot_dimension_numbers<[1], [0], [0], [1], [0, 0, 1, 1], [], []>} : vector<8x32xf32>, vector<32x8xf32>, vector<8x8xf32> -> vector<8x8xf32>
    %c1_71 = arith.constant 1 : index
    %c0_72 = arith.constant 0 : index
    %c0_73 = arith.constant 0 : index
    %87 = vector.load %arg7[%c1_71, %c0_72, %c0_73] : memref<12x1x8xf32, #tpu.memory_space<vmem>>, vector<1x1x8xf32>
    %88 = vector.shape_cast %87 : vector<1x1x8xf32> to vector<1x8xf32>
    %89 = vector.broadcast %88 : vector<1x8xf32> to vector<8x8xf32>
    %90 = arith.addf %86, %89 : vector<8x8xf32>
    %c5 = arith.constant 5 : index
    %c0_74 = arith.constant 0 : index
    %c0_75 = arith.constant 0 : index
    %91 = vector.load %arg6[%c5, %c0_74, %c0_75] : memref<12x32x8xf32, #tpu.memory_space<vmem>>, vector<1x32x8xf32>
    %92 = vector.shape_cast %91 : vector<1x32x8xf32> to vector<32x8xf32>
    %cst_76 = arith.constant dense<0.000000e+00> : vector<8x8xf32>
    %93 = tpu.matmul %46, %92, %cst_76 {dimension_numbers = #tpu.dot_dimension_numbers<[1], [0], [0], [1], [0, 0, 1, 1], [], []>} : vector<8x32xf32>, vector<32x8xf32>, vector<8x8xf32> -> vector<8x8xf32>
    %c5_77 = arith.constant 5 : index
    %c0_78 = arith.constant 0 : index
    %c0_79 = arith.constant 0 : index
    %94 = vector.load %arg7[%c5_77, %c0_78, %c0_79] : memref<12x1x8xf32, #tpu.memory_space<vmem>>, vector<1x1x8xf32>
    %95 = vector.shape_cast %94 : vector<1x1x8xf32> to vector<1x8xf32>
    %96 = vector.broadcast %95 : vector<1x8xf32> to vector<8x8xf32>
    %97 = arith.addf %93, %96 : vector<8x8xf32>
    %c9 = arith.constant 9 : index
    %c0_80 = arith.constant 0 : index
    %c0_81 = arith.constant 0 : index
    %98 = vector.load %arg6[%c9, %c0_80, %c0_81] : memref<12x32x8xf32, #tpu.memory_space<vmem>>, vector<1x32x8xf32>
    %99 = vector.shape_cast %98 : vector<1x32x8xf32> to vector<32x8xf32>
    %cst_82 = arith.constant dense<0.000000e+00> : vector<8x8xf32>
    %100 = tpu.matmul %37, %99, %cst_82 {dimension_numbers = #tpu.dot_dimension_numbers<[1], [0], [0], [1], [0, 0, 1, 1], [], []>} : vector<8x32xf32>, vector<32x8xf32>, vector<8x8xf32> -> vector<8x8xf32>
    %c9_83 = arith.constant 9 : index
    %c0_84 = arith.constant 0 : index
    %c0_85 = arith.constant 0 : index
    %101 = vector.load %arg7[%c9_83, %c0_84, %c0_85] : memref<12x1x8xf32, #tpu.memory_space<vmem>>, vector<1x1x8xf32>
    %102 = vector.shape_cast %101 : vector<1x1x8xf32> to vector<1x8xf32>
    %103 = vector.broadcast %102 : vector<1x8xf32> to vector<8x8xf32>
    %104 = arith.addf %100, %103 : vector<8x8xf32>
    %cst_86 = arith.constant dense<0.000000e+00> : vector<8x8xf32>
    %105 = tpu.matmul %90, %97, %cst_86 {dimension_numbers = #tpu.dot_dimension_numbers<[1], [1], [0], [0], [0, 0, 1, 0], [], []>} : vector<8x8xf32>, vector<8x8xf32>, vector<8x8xf32> -> vector<8x8xf32>
    %cst_87 = arith.constant dense<0xFF800000> : vector<8xf32>
    %106 = vector.multi_reduction <maximumf>, %105, %cst_87 [1] : vector<8x8xf32> to vector<8xf32>
    %107 = vector.shape_cast %106 : vector<8xf32> to vector<8x1xf32>
    %108 = vector.broadcast %107 : vector<8x1xf32> to vector<8x8xf32>
    %109 = arith.subf %105, %108 : vector<8x8xf32>
    %110 = math.exp %109 : vector<8x8xf32>
    %cst_88 = arith.constant dense<0.000000e+00> : vector<8xf32>
    %111 = vector.multi_reduction <add>, %110, %cst_88 [1] : vector<8x8xf32> to vector<8xf32>
    %112 = vector.shape_cast %111 : vector<8xf32> to vector<8x1xf32>
    %113 = vector.broadcast %112 : vector<8x1xf32> to vector<8x8xf32>
    %114 = arith.divf %110, %113 : vector<8x8xf32>
    %cst_89 = arith.constant dense<0.000000e+00> : vector<8x8xf32>
    %115 = tpu.matmul %114, %104, %cst_89 {dimension_numbers = #tpu.dot_dimension_numbers<[1], [0], [0], [1], [0, 0, 1, 1], [], []>} : vector<8x8xf32>, vector<8x8xf32>, vector<8x8xf32> -> vector<8x8xf32>
    %c1_90 = arith.constant 1 : index
    %c0_91 = arith.constant 0 : index
    %c0_92 = arith.constant 0 : index
    %116 = vector.load %arg8[%c1_90, %c0_91, %c0_92] : memref<4x8x32xf32, #tpu.memory_space<vmem>>, vector<1x8x32xf32>
    %117 = vector.shape_cast %116 : vector<1x8x32xf32> to vector<8x32xf32>
    %cst_93 = arith.constant dense<0.000000e+00> : vector<8x32xf32>
    %118 = tpu.matmul %115, %117, %cst_93 {dimension_numbers = #tpu.dot_dimension_numbers<[1], [0], [0], [1], [0, 0, 1, 1], [], []>} : vector<8x8xf32>, vector<8x32xf32>, vector<8x32xf32> -> vector<8x32xf32>
    %119 = arith.addf %83, %118 : vector<8x32xf32>
    %c2_94 = arith.constant 2 : index
    %c0_95 = arith.constant 0 : index
    %c0_96 = arith.constant 0 : index
    %120 = vector.load %arg6[%c2_94, %c0_95, %c0_96] : memref<12x32x8xf32, #tpu.memory_space<vmem>>, vector<1x32x8xf32>
    %121 = vector.shape_cast %120 : vector<1x32x8xf32> to vector<32x8xf32>
    %cst_97 = arith.constant dense<0.000000e+00> : vector<8x8xf32>
    %122 = tpu.matmul %45, %121, %cst_97 {dimension_numbers = #tpu.dot_dimension_numbers<[1], [0], [0], [1], [0, 0, 1, 1], [], []>} : vector<8x32xf32>, vector<32x8xf32>, vector<8x8xf32> -> vector<8x8xf32>
    %c2_98 = arith.constant 2 : index
    %c0_99 = arith.constant 0 : index
    %c0_100 = arith.constant 0 : index
    %123 = vector.load %arg7[%c2_98, %c0_99, %c0_100] : memref<12x1x8xf32, #tpu.memory_space<vmem>>, vector<1x1x8xf32>
    %124 = vector.shape_cast %123 : vector<1x1x8xf32> to vector<1x8xf32>
    %125 = vector.broadcast %124 : vector<1x8xf32> to vector<8x8xf32>
    %126 = arith.addf %122, %125 : vector<8x8xf32>
    %c6 = arith.constant 6 : index
    %c0_101 = arith.constant 0 : index
    %c0_102 = arith.constant 0 : index
    %127 = vector.load %arg6[%c6, %c0_101, %c0_102] : memref<12x32x8xf32, #tpu.memory_space<vmem>>, vector<1x32x8xf32>
    %128 = vector.shape_cast %127 : vector<1x32x8xf32> to vector<32x8xf32>
    %cst_103 = arith.constant dense<0.000000e+00> : vector<8x8xf32>
    %129 = tpu.matmul %46, %128, %cst_103 {dimension_numbers = #tpu.dot_dimension_numbers<[1], [0], [0], [1], [0, 0, 1, 1], [], []>} : vector<8x32xf32>, vector<32x8xf32>, vector<8x8xf32> -> vector<8x8xf32>
    %c6_104 = arith.constant 6 : index
    %c0_105 = arith.constant 0 : index
    %c0_106 = arith.constant 0 : index
    %130 = vector.load %arg7[%c6_104, %c0_105, %c0_106] : memref<12x1x8xf32, #tpu.memory_space<vmem>>, vector<1x1x8xf32>
    %131 = vector.shape_cast %130 : vector<1x1x8xf32> to vector<1x8xf32>
    %132 = vector.broadcast %131 : vector<1x8xf32> to vector<8x8xf32>
    %133 = arith.addf %129, %132 : vector<8x8xf32>
    %c10 = arith.constant 10 : index
    %c0_107 = arith.constant 0 : index
    %c0_108 = arith.constant 0 : index
    %134 = vector.load %arg6[%c10, %c0_107, %c0_108] : memref<12x32x8xf32, #tpu.memory_space<vmem>>, vector<1x32x8xf32>
    %135 = vector.shape_cast %134 : vector<1x32x8xf32> to vector<32x8xf32>
    %cst_109 = arith.constant dense<0.000000e+00> : vector<8x8xf32>
    %136 = tpu.matmul %37, %135, %cst_109 {dimension_numbers = #tpu.dot_dimension_numbers<[1], [0], [0], [1], [0, 0, 1, 1], [], []>} : vector<8x32xf32>, vector<32x8xf32>, vector<8x8xf32> -> vector<8x8xf32>
    %c10_110 = arith.constant 10 : index
    %c0_111 = arith.constant 0 : index
    %c0_112 = arith.constant 0 : index
    %137 = vector.load %arg7[%c10_110, %c0_111, %c0_112] : memref<12x1x8xf32, #tpu.memory_space<vmem>>, vector<1x1x8xf32>
    %138 = vector.shape_cast %137 : vector<1x1x8xf32> to vector<1x8xf32>
    %139 = vector.broadcast %138 : vector<1x8xf32> to vector<8x8xf32>
    %140 = arith.addf %136, %139 : vector<8x8xf32>
    %cst_113 = arith.constant dense<0.000000e+00> : vector<8x8xf32>
    %141 = tpu.matmul %126, %133, %cst_113 {dimension_numbers = #tpu.dot_dimension_numbers<[1], [1], [0], [0], [0, 0, 1, 0], [], []>} : vector<8x8xf32>, vector<8x8xf32>, vector<8x8xf32> -> vector<8x8xf32>
    %cst_114 = arith.constant dense<0xFF800000> : vector<8xf32>
    %142 = vector.multi_reduction <maximumf>, %141, %cst_114 [1] : vector<8x8xf32> to vector<8xf32>
    %143 = vector.shape_cast %142 : vector<8xf32> to vector<8x1xf32>
    %144 = vector.broadcast %143 : vector<8x1xf32> to vector<8x8xf32>
    %145 = arith.subf %141, %144 : vector<8x8xf32>
    %146 = math.exp %145 : vector<8x8xf32>
    %cst_115 = arith.constant dense<0.000000e+00> : vector<8xf32>
    %147 = vector.multi_reduction <add>, %146, %cst_115 [1] : vector<8x8xf32> to vector<8xf32>
    %148 = vector.shape_cast %147 : vector<8xf32> to vector<8x1xf32>
    %149 = vector.broadcast %148 : vector<8x1xf32> to vector<8x8xf32>
    %150 = arith.divf %146, %149 : vector<8x8xf32>
    %cst_116 = arith.constant dense<0.000000e+00> : vector<8x8xf32>
    %151 = tpu.matmul %150, %140, %cst_116 {dimension_numbers = #tpu.dot_dimension_numbers<[1], [0], [0], [1], [0, 0, 1, 1], [], []>} : vector<8x8xf32>, vector<8x8xf32>, vector<8x8xf32> -> vector<8x8xf32>
    %c2_117 = arith.constant 2 : index
    %c0_118 = arith.constant 0 : index
    %c0_119 = arith.constant 0 : index
    %152 = vector.load %arg8[%c2_117, %c0_118, %c0_119] : memref<4x8x32xf32, #tpu.memory_space<vmem>>, vector<1x8x32xf32>
    %153 = vector.shape_cast %152 : vector<1x8x32xf32> to vector<8x32xf32>
    %cst_120 = arith.constant dense<0.000000e+00> : vector<8x32xf32>
    %154 = tpu.matmul %151, %153, %cst_120 {dimension_numbers = #tpu.dot_dimension_numbers<[1], [0], [0], [1], [0, 0, 1, 1], [], []>} : vector<8x8xf32>, vector<8x32xf32>, vector<8x32xf32> -> vector<8x32xf32>
    %155 = arith.addf %119, %154 : vector<8x32xf32>
    %c3_121 = arith.constant 3 : index
    %c0_122 = arith.constant 0 : index
    %c0_123 = arith.constant 0 : index
    %156 = vector.load %arg6[%c3_121, %c0_122, %c0_123] : memref<12x32x8xf32, #tpu.memory_space<vmem>>, vector<1x32x8xf32>
    %157 = vector.shape_cast %156 : vector<1x32x8xf32> to vector<32x8xf32>
    %cst_124 = arith.constant dense<0.000000e+00> : vector<8x8xf32>
    %158 = tpu.matmul %45, %157, %cst_124 {dimension_numbers = #tpu.dot_dimension_numbers<[1], [0], [0], [1], [0, 0, 1, 1], [], []>} : vector<8x32xf32>, vector<32x8xf32>, vector<8x8xf32> -> vector<8x8xf32>
    %c3_125 = arith.constant 3 : index
    %c0_126 = arith.constant 0 : index
    %c0_127 = arith.constant 0 : index
    %159 = vector.load %arg7[%c3_125, %c0_126, %c0_127] : memref<12x1x8xf32, #tpu.memory_space<vmem>>, vector<1x1x8xf32>
    %160 = vector.shape_cast %159 : vector<1x1x8xf32> to vector<1x8xf32>
    %161 = vector.broadcast %160 : vector<1x8xf32> to vector<8x8xf32>
    %162 = arith.addf %158, %161 : vector<8x8xf32>
    %c7 = arith.constant 7 : index
    %c0_128 = arith.constant 0 : index
    %c0_129 = arith.constant 0 : index
    %163 = vector.load %arg6[%c7, %c0_128, %c0_129] : memref<12x32x8xf32, #tpu.memory_space<vmem>>, vector<1x32x8xf32>
    %164 = vector.shape_cast %163 : vector<1x32x8xf32> to vector<32x8xf32>
    %cst_130 = arith.constant dense<0.000000e+00> : vector<8x8xf32>
    %165 = tpu.matmul %46, %164, %cst_130 {dimension_numbers = #tpu.dot_dimension_numbers<[1], [0], [0], [1], [0, 0, 1, 1], [], []>} : vector<8x32xf32>, vector<32x8xf32>, vector<8x8xf32> -> vector<8x8xf32>
    %c7_131 = arith.constant 7 : index
    %c0_132 = arith.constant 0 : index
    %c0_133 = arith.constant 0 : index
    %166 = vector.load %arg7[%c7_131, %c0_132, %c0_133] : memref<12x1x8xf32, #tpu.memory_space<vmem>>, vector<1x1x8xf32>
    %167 = vector.shape_cast %166 : vector<1x1x8xf32> to vector<1x8xf32>
    %168 = vector.broadcast %167 : vector<1x8xf32> to vector<8x8xf32>
    %169 = arith.addf %165, %168 : vector<8x8xf32>
    %c11 = arith.constant 11 : index
    %c0_134 = arith.constant 0 : index
    %c0_135 = arith.constant 0 : index
    %170 = vector.load %arg6[%c11, %c0_134, %c0_135] : memref<12x32x8xf32, #tpu.memory_space<vmem>>, vector<1x32x8xf32>
    %171 = vector.shape_cast %170 : vector<1x32x8xf32> to vector<32x8xf32>
    %cst_136 = arith.constant dense<0.000000e+00> : vector<8x8xf32>
    %172 = tpu.matmul %37, %171, %cst_136 {dimension_numbers = #tpu.dot_dimension_numbers<[1], [0], [0], [1], [0, 0, 1, 1], [], []>} : vector<8x32xf32>, vector<32x8xf32>, vector<8x8xf32> -> vector<8x8xf32>
    %c11_137 = arith.constant 11 : index
    %c0_138 = arith.constant 0 : index
    %c0_139 = arith.constant 0 : index
    %173 = vector.load %arg7[%c11_137, %c0_138, %c0_139] : memref<12x1x8xf32, #tpu.memory_space<vmem>>, vector<1x1x8xf32>
    %174 = vector.shape_cast %173 : vector<1x1x8xf32> to vector<1x8xf32>
    %175 = vector.broadcast %174 : vector<1x8xf32> to vector<8x8xf32>
    %176 = arith.addf %172, %175 : vector<8x8xf32>
    %cst_140 = arith.constant dense<0.000000e+00> : vector<8x8xf32>
    %177 = tpu.matmul %162, %169, %cst_140 {dimension_numbers = #tpu.dot_dimension_numbers<[1], [1], [0], [0], [0, 0, 1, 0], [], []>} : vector<8x8xf32>, vector<8x8xf32>, vector<8x8xf32> -> vector<8x8xf32>
    %cst_141 = arith.constant dense<0xFF800000> : vector<8xf32>
    %178 = vector.multi_reduction <maximumf>, %177, %cst_141 [1] : vector<8x8xf32> to vector<8xf32>
    %179 = vector.shape_cast %178 : vector<8xf32> to vector<8x1xf32>
    %180 = vector.broadcast %179 : vector<8x1xf32> to vector<8x8xf32>
    %181 = arith.subf %177, %180 : vector<8x8xf32>
    %182 = math.exp %181 : vector<8x8xf32>
    %cst_142 = arith.constant dense<0.000000e+00> : vector<8xf32>
    %183 = vector.multi_reduction <add>, %182, %cst_142 [1] : vector<8x8xf32> to vector<8xf32>
    %184 = vector.shape_cast %183 : vector<8xf32> to vector<8x1xf32>
    %185 = vector.broadcast %184 : vector<8x1xf32> to vector<8x8xf32>
    %186 = arith.divf %182, %185 : vector<8x8xf32>
    %cst_143 = arith.constant dense<0.000000e+00> : vector<8x8xf32>
    %187 = tpu.matmul %186, %176, %cst_143 {dimension_numbers = #tpu.dot_dimension_numbers<[1], [0], [0], [1], [0, 0, 1, 1], [], []>} : vector<8x8xf32>, vector<8x8xf32>, vector<8x8xf32> -> vector<8x8xf32>
    %c3_144 = arith.constant 3 : index
    %c0_145 = arith.constant 0 : index
    %c0_146 = arith.constant 0 : index
    %188 = vector.load %arg8[%c3_144, %c0_145, %c0_146] : memref<4x8x32xf32, #tpu.memory_space<vmem>>, vector<1x8x32xf32>
    %189 = vector.shape_cast %188 : vector<1x8x32xf32> to vector<8x32xf32>
    %cst_147 = arith.constant dense<0.000000e+00> : vector<8x32xf32>
    %190 = tpu.matmul %187, %189, %cst_147 {dimension_numbers = #tpu.dot_dimension_numbers<[1], [0], [0], [1], [0, 0, 1, 1], [], []>} : vector<8x8xf32>, vector<8x32xf32>, vector<8x32xf32> -> vector<8x32xf32>
    %191 = arith.addf %155, %190 : vector<8x32xf32>
    %c8_148 = arith.constant 8 : index
    %c0_149 = arith.constant 0 : index
    %c0_150 = arith.constant 0 : index
    %192 = vector.load %arg5[%c8_148, %c0_149, %c0_150] : memref<9x1x32xf32, #tpu.memory_space<vmem>>, vector<1x1x32xf32>
    %193 = vector.shape_cast %192 : vector<1x1x32xf32> to vector<1x32xf32>
    %194 = vector.broadcast %193 : vector<1x32xf32> to vector<8x32xf32>
    %195 = arith.addf %191, %194 : vector<8x32xf32>
    %196 = vector.extract_strided_slice %3 {offsets = [0, 0], sizes = [8, 8], strides = [1, 1]} : vector<16x8xf32> to vector<8x8xf32>
    %c3_151 = arith.constant 3 : index
    %c0_152 = arith.constant 0 : index
    %c0_153 = arith.constant 0 : index
    %197 = vector.load %arg4[%c3_151, %c0_152, %c0_153] : memref<6x32x32xf32, #tpu.memory_space<vmem>>, vector<1x32x32xf32>
    %198 = vector.shape_cast %197 : vector<1x32x32xf32> to vector<32x32xf32>
    %cst_154 = arith.constant dense<0.000000e+00> : vector<8x32xf32>
    %199 = tpu.matmul %195, %198, %cst_154 {dimension_numbers = #tpu.dot_dimension_numbers<[1], [0], [0], [1], [0, 0, 1, 1], [], []>} : vector<8x32xf32>, vector<32x32xf32>, vector<8x32xf32> -> vector<8x32xf32>
    %c2_155 = arith.constant 2 : index
    %c0_156 = arith.constant 0 : index
    %c0_157 = arith.constant 0 : index
    %200 = vector.load %arg3[%c2_155, %c0_156, %c0_157] : memref<3x8x32xf32, #tpu.memory_space<vmem>>, vector<1x8x32xf32>
    %201 = vector.shape_cast %200 : vector<1x8x32xf32> to vector<8x32xf32>
    %cst_158 = arith.constant dense<0.000000e+00> : vector<8x32xf32>
    %202 = tpu.matmul %196, %201, %cst_158 {dimension_numbers = #tpu.dot_dimension_numbers<[1], [0], [0], [1], [0, 0, 1, 1], [], []>} : vector<8x8xf32>, vector<8x32xf32>, vector<8x32xf32> -> vector<8x32xf32>
    %203 = arith.addf %199, %202 : vector<8x32xf32>
    %c5_159 = arith.constant 5 : index
    %c0_160 = arith.constant 0 : index
    %c0_161 = arith.constant 0 : index
    %204 = vector.load %arg5[%c5_159, %c0_160, %c0_161] : memref<9x1x32xf32, #tpu.memory_space<vmem>>, vector<1x1x32xf32>
    %205 = vector.shape_cast %204 : vector<1x1x32xf32> to vector<1x32xf32>
    %206 = vector.broadcast %205 : vector<1x32xf32> to vector<8x32xf32>
    %207 = arith.addf %203, %206 : vector<8x32xf32>
    %cst_162 = arith.constant 0.000000e+00 : f32
    %208 = vector.broadcast %cst_162 : f32 to vector<8x32xf32>
    %209 = arith.maximumf %207, %208 : vector<8x32xf32>
    %c4_163 = arith.constant 4 : index
    %c0_164 = arith.constant 0 : index
    %c0_165 = arith.constant 0 : index
    %210 = vector.load %arg4[%c4_163, %c0_164, %c0_165] : memref<6x32x32xf32, #tpu.memory_space<vmem>>, vector<1x32x32xf32>
    %211 = vector.shape_cast %210 : vector<1x32x32xf32> to vector<32x32xf32>
    %cst_166 = arith.constant dense<0.000000e+00> : vector<8x32xf32>
    %212 = tpu.matmul %209, %211, %cst_166 {dimension_numbers = #tpu.dot_dimension_numbers<[1], [0], [0], [1], [0, 0, 1, 1], [], []>} : vector<8x32xf32>, vector<32x32xf32>, vector<8x32xf32> -> vector<8x32xf32>
    %c6_167 = arith.constant 6 : index
    %c0_168 = arith.constant 0 : index
    %c0_169 = arith.constant 0 : index
    %213 = vector.load %arg5[%c6_167, %c0_168, %c0_169] : memref<9x1x32xf32, #tpu.memory_space<vmem>>, vector<1x1x32xf32>
    %214 = vector.shape_cast %213 : vector<1x1x32xf32> to vector<1x32xf32>
    %215 = vector.broadcast %214 : vector<1x32xf32> to vector<8x32xf32>
    %216 = arith.addf %212, %215 : vector<8x32xf32>
    %cst_170 = arith.constant 0.000000e+00 : f32
    %217 = vector.broadcast %cst_170 : f32 to vector<8x32xf32>
    %218 = arith.maximumf %216, %217 : vector<8x32xf32>
    %c5_171 = arith.constant 5 : index
    %c0_172 = arith.constant 0 : index
    %c0_173 = arith.constant 0 : index
    %219 = vector.load %arg4[%c5_171, %c0_172, %c0_173] : memref<6x32x32xf32, #tpu.memory_space<vmem>>, vector<1x32x32xf32>
    %220 = vector.shape_cast %219 : vector<1x32x32xf32> to vector<32x32xf32>
    %cst_174 = arith.constant dense<0.000000e+00> : vector<8x32xf32>
    %221 = tpu.matmul %218, %220, %cst_174 {dimension_numbers = #tpu.dot_dimension_numbers<[1], [0], [0], [1], [0, 0, 1, 1], [], []>} : vector<8x32xf32>, vector<32x32xf32>, vector<8x32xf32> -> vector<8x32xf32>
    %c7_175 = arith.constant 7 : index
    %c0_176 = arith.constant 0 : index
    %c0_177 = arith.constant 0 : index
    %222 = vector.load %arg5[%c7_175, %c0_176, %c0_177] : memref<9x1x32xf32, #tpu.memory_space<vmem>>, vector<1x1x32xf32>
    %223 = vector.shape_cast %222 : vector<1x1x32xf32> to vector<1x32xf32>
    %224 = vector.broadcast %223 : vector<1x32xf32> to vector<8x32xf32>
    %225 = arith.addf %221, %224 : vector<8x32xf32>
    %cst_178 = arith.constant 0.000000e+00 : f32
    %226 = vector.broadcast %cst_178 : f32 to vector<8x32xf32>
    %227 = arith.maximumf %225, %226 : vector<8x32xf32>
    %c0_179 = arith.constant 0 : index
    %c0_180 = arith.constant 0 : index
    %228 = vector.load %arg9[%c0_179, %c0_180] : memref<33x128xf32, #tpu.memory_space<vmem>>, vector<33x128xf32>
    %229 = vector.extract_strided_slice %228 {offsets = [0, 0], sizes = [32, 128], strides = [1, 1]} : vector<33x128xf32> to vector<32x128xf32>
    %cst_181 = arith.constant dense<0.000000e+00> : vector<8x128xf32>
    %230 = tpu.matmul %227, %229, %cst_181 {dimension_numbers = #tpu.dot_dimension_numbers<[1], [0], [0], [1], [0, 0, 1, 1], [], []>} : vector<8x32xf32>, vector<32x128xf32>, vector<8x128xf32> -> vector<8x128xf32>
    %231 = vector.extract_strided_slice %228 {offsets = [32, 0], sizes = [1, 128], strides = [1, 1]} : vector<33x128xf32> to vector<1x128xf32>
    %232 = vector.broadcast %231 : vector<1x128xf32> to vector<8x128xf32>
    %233 = arith.addf %230, %232 : vector<8x128xf32>
    %c0_182 = arith.constant 0 : index
    %c0_183 = arith.constant 0 : index
    %c0_184 = arith.constant 0 : index
    %234 = vector.load %arg10[%c0_182, %c0_183, %c0_184] : memref<1x8x128xf32, #tpu.memory_space<vmem>>, vector<1x8x128xf32>
    %235 = vector.shape_cast %234 : vector<1x8x128xf32> to vector<8x128xf32>
    %236 = vector.shape_cast %233 : vector<8x128xf32> to vector<1x8x128xf32>
    tpu.vector_store %arg10[%c0_182, %c0_183, %c0_184], %236 {strides = array<i32>} : memref<1x8x128xf32, #tpu.memory_space<vmem>>, vector<1x8x128xf32>,
    return
  }
  func.func @transform_0(%arg0: i32) -> (i32, i32, i32) {
    %c0_i32 = arith.constant 0 : i32
    %c0_i32_0 = arith.constant 0 : i32
    %c0_i32_1 = arith.constant 0 : i32
    return %arg0, %c0_i32, %c0_i32_0 : i32, i32, i32
  }
  func.func @transform_1(%arg0: i32) -> (i32, i32, i32) {
    %c0_i32 = arith.constant 0 : i32
    %c0_i32_0 = arith.constant 0 : i32
    %c0_i32_1 = arith.constant 0 : i32
    return %arg0, %c0_i32, %c0_i32_0 : i32, i32, i32
  }
  func.func @transform_2(%arg0: i32) -> (i32, i32, i32) {
    %c0_i32 = arith.constant 0 : i32
    %c0_i32_0 = arith.constant 0 : i32
    %c0_i32_1 = arith.constant 0 : i32
    %c0_i32_2 = arith.constant 0 : i32
    return %c0_i32, %c0_i32_0, %c0_i32_1 : i32, i32, i32
  }
  func.func @transform_3(%arg0: i32) -> (i32, i32, i32) {
    %c0_i32 = arith.constant 0 : i32
    %c0_i32_0 = arith.constant 0 : i32
    %c0_i32_1 = arith.constant 0 : i32
    %c0_i32_2 = arith.constant 0 : i32
    return %c0_i32, %c0_i32_0, %c0_i32_1 : i32, i32, i32
  }
  func.func @transform_4(%arg0: i32) -> (i32, i32, i32) {
    %c0_i32 = arith.constant 0 : i32
    %c0_i32_0 = arith.constant 0 : i32
    %c0_i32_1 = arith.constant 0 : i32
    %c0_i32_2 = arith.constant 0 : i32
    return %c0_i32, %c0_i32_0, %c0_i32_1 : i32, i32, i32
  }
  func.func @transform_5(%arg0: i32) -> (i32, i32, i32) {
    %c0_i32 = arith.constant 0 : i32
    %c0_i32_0 = arith.constant 0 : i32
    %c0_i32_1 = arith.constant 0 : i32
    %c0_i32_2 = arith.constant 0 : i32
    return %c0_i32, %c0_i32_0, %c0_i32_1 : i32, i32, i32
  }
  func.func @transform_6(%arg0: i32) -> (i32, i32, i32) {
    %c0_i32 = arith.constant 0 : i32
    %c0_i32_0 = arith.constant 0 : i32
    %c0_i32_1 = arith.constant 0 : i32
    %c0_i32_2 = arith.constant 0 : i32
    return %c0_i32, %c0_i32_0, %c0_i32_1 : i32, i32, i32
  }
  func.func @transform_7(%arg0: i32) -> (i32, i32, i32) {
    %c0_i32 = arith.constant 0 : i32
    %c0_i32_0 = arith.constant 0 : i32
    %c0_i32_1 = arith.constant 0 : i32
    %c0_i32_2 = arith.constant 0 : i32
    return %c0_i32, %c0_i32_0, %c0_i32_1 : i32, i32, i32
  }
  func.func @transform_8(%arg0: i32) -> (i32, i32) {
    %c0_i32 = arith.constant 0 : i32
    %c0_i32_0 = arith.constant 0 : i32
    %c0_i32_1 = arith.constant 0 : i32
    return %c0_i32, %c0_i32_0 : i32, i32
  }
  func.func @transform_9(%arg0: i32) -> (i32, i32, i32) {
    %c0_i32 = arith.constant 0 : i32
    %c0_i32_0 = arith.constant 0 : i32
    %c0_i32_1 = arith.constant 0 : i32
    return %arg0, %c0_i32, %c0_i32_0 : i32, i32, i32
  }
}

</mosaic_0001>

<bundles_post_ra>
// kernel: attn_cnp_forward.1
= control target key start
LH: loop header
LB: loop body
LE: loop exit
PB: predicated region body
PF: predicated region fallthrough
CT: control target
= control target key end

     0   :  { %s3877_s30 = smov 0   ;;  %s4451_s0 = inlined_call_operand.vmem [shape: f32[2,8,8], index: 0, kind: input, shape index: {}]   ;;  %s4452_s1 = inlined_call_operand.vmem [shape: f32[2,16,8], index: 1, kind: input, shape index: {}]   ;;  %s4453_s2 = inlined_call_operand.vmem [shape: f32[3,8,32], index: 2, kind: input, shape index: {}]   ;;  %s4454_s3 = inlined_call_operand.vmem [shape: f32[6,32,32], index: 3, kind: input, shape index: {}]   ;;  %s4455_s4 = inlined_call_operand.vmem [shape: f32[9,1,32], index: 4, kind: input, shape index: {}]   ;;  %s4456_s5 = inlined_call_operand.vmem [shape: f32[12,32,8], index: 5, kind: input, shape index: {}]   ;;  %s4457_s6 = inlined_call_operand.vmem [shape: f32[12,1,8], index: 6, kind: input, shape index: {}]   ;;  %s4458_s7 = inlined_call_operand.vmem [shape: f32[4,8,32], index: 7, kind: input, shape index: {}]   ;;  %s4459_s8 = inlined_call_operand.vmem [shape: f32[33,128], index: 8, kind: input, shape index: {}]   ;;  %s4460_s9 = inlined_call_operand.vmem [shape: f32[2,8,128], index: 9, kind: output, shape index: {}]  }
   0x1 LB: > { %s3220_s10 = sadd.s32 4294967295, %s3823_s30   ;;  %p3224_p0 = scmp.ge.s32.totalorder %s3823_s30, 1  ;;  %s3823_s30 = sphi %s3877_s30, %s19_s30  }
   0x2   : > { %p296_p1 = scmp.lt.s32.totalorder %s3823_s30, 3 }
   0x4   : > { %p297_p2 = pnand %p3224_p0, %p296_p1 }
   0x5   : > { %p335_p3 = scmp.lt.s32.totalorder (!%p297_p2), %s3220_s10, 1 }
   0x6   : > { %300 = sbr.rel (%p297_p2) target bundleno = 5013 (0x1395), region = 56 }
   0xb   : > { %v351_v0 = vld [vmem:[%s4453_s2] sm:$0xff]  ;;  %v437_v1 = vld [vmem:[%s4454_s3 + $0x18] sm:$0xff]  ;;  %v3825_v2 = vmov 0.0   ;;  %vm3826_vm0 = vmmov 0   ;;  %s4462_s10 = smov (!%p335_p3, %s3220_s10), 1  ;;  %vm359_vm1 = vcmask 64512  }
   0xc   : > { %3507 = vmatprep.subr.mxu0 %v3825_v2  ;;  %3509 = vmatprep.mubr.msk.f32.mxu0 %vm3826_vm0, %v3825_v2  ;;  %s3225_s15 = sshll.u32 %s4462_s10, 3  ;;  %v436_v4 = vld [vmem:[%s4454_s3 + $0x10] sm:$0xff]  ;;  %v435_v5 = vld [vmem:[%s4454_s3 + $0x8] sm:$0xff]  ;;  %v434_v6 = vld [vmem:[%s4454_s3] sm:$0xff]  ;;  %vm446_vm2 = vcmask 261120   ;;  %s3380_s23 = sshll.u32 %s4462_s10, 4 }
   0xd   : > { %3508 = vmatpush3.msra.mxu0 %v351_v0  ;;  %3512 = vmatprep.subr.mxu1 %v3825_v2  ;;  %s338_s18 = scalar_lea.vmem %s4451_s0, %s3225_s15  ;;  %v3237_v7 = vld [vmem:[%s4454_s3 + $0x38] sm:$0xff]  ;;  %v3229_v8 = vld [vmem:[%s4455_s4] ss:$0 sm:$0xff]  ;;  %v3236_v13 = vld [vmem:[%s4454_s3 + $0x30] sm:$0xff]  ;;  %s343_s28 = scalar_lea.vmem %s4452_s1, %s3380_s23 }
   0xe   : > { %3513 = vmatpush3.msra.mxu1 %v437_v1  ;;  %3520 = vmatprep.mubr.msk.f32.mxu1 %vm3826_vm0, %v3825_v2  ;;  %v348_v3 = vld [vmem:[%s338_s18] sm:$0xff]  ;;  %v3235_v14 = vld [vmem:[%s4454_s3 + $0x28] sm:$0xff]  ;;  %v3244_v17 = vld [vmem:[%s4454_s3 + $0x58] sm:$0xff]  ;;  %s347_s14 = scalar_lea.vmem %s4460_s9, %s3225_s15 }
   0xf   : > { %3514 = vmatprep.subr.mxu1 %v3825_v2  ;;  %3523 = vmatprep.subr.mxu0 %v3825_v2  ;;  %v3234_v15 = vld [vmem:[%s4454_s3 + $0x20] sm:$0xff]  ;;  %v3248_v16 = vld [vmem:[%s4453_s2 + $0x8] sm:$0xff]  ;;  %v3243_v18 = vld [vmem:[%s4454_s3 + $0x50] sm:$0xff] }
  0x10   : > { %3510 = vmatmul.mubr.msk.f32.vlgmr.msra.gmra.mxu0 %vm359_vm1, %v348_v3  ;;  %3515 = vmatpush3.msra.mxu1 %v436_v4  ;;  %v3232_v19 = vld [vmem:[%s4455_s4 + $0x1] ss:$0 sm:$0xff]  ;;  %v350_v25 = vld [vmem:[%s343_s28 + $0x8] sm:$0xff]  ;;  %v788_v28 = vld [vmem:[%s4456_s5 + $0x18] sm:$0xff] }
  0x11   : > { %3531 = vmatprep.mubr.msk.f32.mxu0 %vm3826_vm0, %v3825_v2  ;;  %3516 = vmatprep.subr.mxu1 %v3825_v2  ;;  %v3961_v24 = vld [vmem:[%s343_s28] sm:$0xff]  ;;  %v3242_v26 = vld [vmem:[%s4454_s3 + $0x48] sm:$0xff]  ;;  %v787_v29 = vld [vmem:[%s4456_s5 + $0x10] sm:$0xff] }
  0x12   : > { %3517 = vmatpush3.msra.mxu1 %v435_v5  ;;  %3524 = vmatpush3.msra.mxu0 %v3237_v7  ;;  %v3241_v27 = vld [vmem:[%s4454_s3 + $0x40] sm:$0xff]  ;;  %v786_v30 = vld [vmem:[%s4456_s5 + $0x8] sm:$0xff]  ;;  %v3258_v37 = vld [vmem:[%s4456_s5 + $0x98] sm:$0xff] }
  0x13   : > { %3518 = vmatprep.subr.mxu1 %v3825_v2  ;;  %3525 = vmatprep.subr.mxu0 %v3825_v2  ;;  %v785_v31 = vld [vmem:[%s4456_s5] sm:$0xff]  ;;  %v3257_v40 = vld [vmem:[%s4456_s5 + $0x90] sm:$0xff]  ;;  %v3256_v43 = vld [vmem:[%s4456_s5 + $0x88] sm:$0xff] }
  0x14   : > { %3519 = vmatpush3.msra.mxu1 %v434_v6  ;;  %3526 = vmatpush3.msra.mxu0 %v3236_v13  ;;  %v3239_v32 = vld [vmem:[%s4455_s4 + $0x2] ss:$0 sm:$0xff]  ;;  %v3250_v39 = vld [vmem:[%s4455_s4 + $0x4] ss:$0 sm:$0xff]  ;;  %v3265_v44 = vld [vmem:[%s4456_s5 + $0x118] sm:$0xff] }
  0x15   : > { %3534 = vmatprep.subr.mxu1 %v3825_v2  ;;  %3527 = vmatprep.subr.mxu0 %v3825_v2  ;;  %v3255_v46 = vld [vmem:[%s4456_s5 + $0x80] sm:$0xff]  ;;  %v3264_v47 = vld [vmem:[%s4456_s5 + $0x110] sm:$0xff]  ;;  %v3263_v48 = vld [vmem:[%s4456_s5 + $0x108] sm:$0xff] }
  0x16   : > { %3528 = vmatpush3.msra.mxu0 %v3235_v14  ;;  %v3262_v49 = vld [vmem:[%s4456_s5 + $0x100] sm:$0xff]  ;;  %v3275_v53 = vld [vmem:[%s4456_s5 + $0x38] sm:$0xff]  ;;  %v3274_v55 = vld [vmem:[%s4456_s5 + $0x30] sm:$0xff] }
  0x17   : > { %3529 = vmatprep.subr.mxu0 %v3825_v2  ;;  %v3246_v50 = vld [vmem:[%s4455_s4 + $0x3] ss:$0 sm:$0xff]  ;;  %v3273_v57 = vld [vmem:[%s4456_s5 + $0x28] sm:$0xff]  ;;  %v3260_v59 = vld [vmem:[%s4457_s6 + $0x4] ss:$0 sm:$0xff] }
  0x18   : > { %3530 = vmatpush3.msra.mxu0 %v3234_v15  ;;  %v3272_v60 = vld [vmem:[%s4456_s5 + $0x20] sm:$0xff]  ;;  %v3289_v1 = vld [vmem:[%s4456_s5 + $0x138] sm:$0xff]  ;;  %v3288_v4 = vld [vmem:[%s4456_s5 + $0x130] sm:$0xff] }
  0x19   : > { %3545 = vmatprep.subr.mxu0 %v3248_v16  ;;  %v3253_v62 = vld [vmem:[%s4457_s6] ss:$0 sm:$0xff]  ;;  %v3287_v5 = vld [vmem:[%s4456_s5 + $0x128] sm:$0xff] }
  0x1a   : > { %v3286_v6 = vld [vmem:[%s4456_s5 + $0x120] sm:$0xff]  ;;  %v3267_v7 = vld [vmem:[%s4457_s6 + $0x8] ss:$0 sm:$0xff] }
  0xd0   : > { %v429_v9 = vpop.f32.mrf.mxu0 }
  0xd1   : > { %v430_v10 = vadd.f32 %v3229_v8, %v429_v9 }
  0xd2   : > { %v3511_v11 = vpop.f32.mrf.mxu0 }
  0xd3   : > { %v433_v12 = vmax.f32 %v430_v10, 0.0 }
  0xd5   : > { %3521 = vmatmul.mubr.msk.f32.vlgmr.msra.gmra.mxu1 %vm446_vm2, %v433_v12 }
  0xd6   : > { %3542 = vmatprep.mubr.msk.f32.mxu1 %vm3826_vm0, %v3825_v2  ;;  %3535 = vmatpush3.msra.mxu1 %v3244_v17 }
  0xd7   : > { %3536 = vmatprep.subr.mxu1 %v3825_v2 }
  0xd8   : > { %3537 = vmatpush3.msra.mxu1 %v3243_v18 }
  0xd9   : > { %3538 = vmatprep.subr.mxu1 %v3825_v2 }
  0xda   : > { %3539 = vmatpush3.msra.mxu1 %v3242_v26 }
  0xdb   : > { %3540 = vmatprep.subr.mxu1 %v3825_v2 }
  0xdc   : > { %3541 = vmatpush3.msra.mxu1 %v3241_v27  ;;  %v3282_v27 = vld [vmem:[%s4456_s5 + $0xb8] sm:$0xff] }
  0xdd   : > { %3561 = vmatprep.subr.mxu1 %v3825_v2 }
 0x195   : > { %v516_v20 = vpop.f32.mrf.mxu1 }
 0x196   : > { %v517_v21 = vadd.f32 %v3232_v19, %v516_v20 }
 0x197   : > { %v3522_v22 = vpop.f32.mrf.mxu1 }
 0x198   : > { %v520_v23 = vmax.f32 %v517_v21, 0.0 }
 0x19a   : > { %3532 = vmatmul.mubr.msk.f32.vlgmr.msra.gmra.mxu0 %vm446_vm2, %v520_v23 }
 0x19b   : > { %3546 = vmatpush3.msra.mxu0 %v3248_v16  ;;  %3547 = vmatprep.mubr.msk.f32.mxu0 %vm359_vm1, %v3961_v24 }
 0x19c   : > { %3550 = vmatprep.subr.mxu0 %v3825_v2 }
 0x19e   : > { %3548 = vmatmul.mubr.msk.f32.vlgmr.msra.gmra.mxu0 %vm359_vm1, %v350_v25 }
 0x19f   : > { %3558 = vmatprep.mubr.msk.f32.mxu0 %vm3826_vm0, %v3825_v2  ;;  %3551 = vmatpush3.msra.mxu0 %v788_v28  ;;  %v3281_v28 = vld [vmem:[%s4456_s5 + $0xb0] sm:$0xff] }
 0x1a0   : > { %3552 = vmatprep.subr.mxu0 %v3825_v2 }
 0x1a1   : > { %3553 = vmatpush3.msra.mxu0 %v787_v29  ;;  %v3280_v29 = vld [vmem:[%s4456_s5 + $0xa8] sm:$0xff] }
 0x1a2   : > { %3554 = vmatprep.subr.mxu0 %v3825_v2 }
 0x1a3   : > { %3555 = vmatpush3.msra.mxu0 %v786_v30  ;;  %v3279_v30 = vld [vmem:[%s4456_s5 + $0xa0] sm:$0xff] }
 0x1a4   : > { %3556 = vmatprep.subr.mxu0 %v3825_v2 }
 0x1a5   : > { %3557 = vmatpush3.msra.mxu0 %v785_v31 }
 0x1a6   : > { %3572 = vmatprep.subr.mxu0 %v3825_v2 }
 0x25a   : > { %v603_v33 = vpop.f32.mrf.mxu0 }
 0x25b   : > { %v604_v34 = vadd.f32 %v3239_v32, %v603_v33  ;;  %v3284_v33 = vld [vmem:[%s4457_s6 + $0x5] ss:$0 sm:$0xff] }
 0x25c   : > { %v3533_v35 = vpop.f32.mrf.mxu0 }
 0x25d   : > { %v607_v36 = vmax.f32 %v604_v34, 0.0  ;;  %v3277_v35 = vld [vmem:[%s4457_s6 + $0x1] ss:$0 sm:$0xff] }
 0x25e   : > { %v3549_v38 = vpop.f32.mrf.mxu0 }
 0x25f   : > { %3543 = vmatmul.mubr.msk.f32.vlgmr.msra.gmra.mxu1 %vm446_vm2, %v607_v36  ;;  %v4018_v45 = vadd.f32 %v3549_v38, %v3250_v39 }
 0x260   : > { %3562 = vmatpush3.msra.mxu1 %v3258_v37  ;;  %v776_v41 = vpop.f32.mrf.mxu0  ;;  %3569 = vmatprep.mubr.msk.f32.mxu1 %vm3826_vm0, %v3825_v2  ;;  %v3291_v37 = vld [vmem:[%s4457_s6 + $0x9] ss:$0 sm:$0xff] }
 0x261   : > { %3563 = vmatprep.subr.mxu1 %v3825_v2  ;;  %v4010_v42 = vadd.f32 %v3250_v39, %v776_v41 }
 0x262   : > { %3564 = vmatpush3.msra.mxu1 %v3257_v40 }
 0x263   : > { %3565 = vmatprep.subr.mxu1 %v3825_v2  ;;  %3559 = vmatmul.mubr.msk.f32.vlgmr.msra.gmra.mxu0 %vm446_vm2, %v4010_v42 }
 0x264   : > { %3566 = vmatpush3.msra.mxu1 %v3256_v43  ;;  %3573 = vmatpush3.msra.mxu0 %v3265_v44 }
 0x265   : > { %3567 = vmatprep.subr.mxu1 %v3825_v2  ;;  %3574 = vmatprep.subr.mxu0 %v3825_v2 }
 0x266   : > { %3568 = vmatpush3.msra.mxu1 %v3255_v46  ;;  %3575 = vmatpush3.msra.mxu0 %v3264_v47 }
 0x267   : > { %3570 = vmatmul.mubr.msk.f32.vlgmr.msra.gmra.mxu1 %vm446_vm2, %v4018_v45  ;;  %3576 = vmatprep.subr.mxu0 %v3825_v2 }
 0x268   : > { %3577 = vmatpush3.msra.mxu0 %v3263_v48  ;;  %3580 = vmatprep.mubr.msk.f32.mxu0 %vm3826_vm0, %v3825_v2 }
 0x269   : > { %3578 = vmatprep.subr.mxu0 %v3825_v2  ;;  %3583 = vmatprep.subr.mxu1 %v3825_v2 }
 0x26a   : > { %3585 = vmatprep.mubr.msk.f32.mxu1 %vm3826_vm0, %v3825_v2  ;;  %3579 = vmatpush3.msra.mxu0 %v3262_v49 }
 0x26b   : > { %3593 = vmatprep.subr.mxu0 %v3825_v2 }
 0x31f   : > { %v690_v51 = vpop.f32.mrf.mxu1 }
 0x320   : > { %v4050_v52 = vadd.f32 %v3246_v50, %v690_v51  ;;  %v3296_v51 = vld [vmem:[%s4458_s7 + $0x8] sm:$0xff] }
 0x321   : > { %v3544_v54 = vpop.f32.mrf.mxu1 }
 0x322   : > { %3581 = vmatmul.mubr.msk.f32.vlgmr.msra.gmra.mxu0 %vm446_vm2, %v4050_v52 }
 0x323   : > { %3594 = vmatpush3.msra.mxu0 %v3275_v53  ;;  %v865_v56 = vpop.f32.mrf.mxu0  ;;  %3601 = vmatprep.mubr.msk.f32.mxu0 %vm3826_vm0, %v3825_v2 }
 0x324   : > { %3595 = vmatprep.subr.mxu0 %v3825_v2  ;;  %v866_v3 = vadd.f32 %v3253_v62, %v865_v56  ;;  %v1201_v56 = vld [vmem:[%s4458_s7] sm:$0xff] }
 0x325   : > { %3596 = vmatpush3.msra.mxu0 %v3274_v55  ;;  %v3560_v58 = vpop.f32.mrf.mxu0 }
 0x326   : > { %3597 = vmatprep.subr.mxu0 %v3825_v2  ;;  %v3308_v58 = vld [vmem:[%s4456_s5 + $0xd0] sm:$0xff] }
 0x327   : > { %v951_v61 = vpop.f32.mrf.mxu1  ;;  %3598 = vmatpush3.msra.mxu0 %v3273_v57  ;;  %v3309_v57 = vld [vmem:[%s4456_s5 + $0xd8] sm:$0xff] }
 0x328   : > { %v952_v63 = vadd.f32 %v3260_v59, %v951_v61  ;;  %3599 = vmatprep.subr.mxu0 %v3825_v2  ;;  %v3307_v59 = vld [vmem:[%s4456_s5 + $0xc8] sm:$0xff]  ;;  %v3302_v61 = vld [vmem:[%s4456_s5 + $0x58] sm:$0xff] }
 0x329   : > { %v3571_v0 = vpop.f32.mrf.mxu1  ;;  %3600 = vmatpush3.msra.mxu0 %v3272_v60  ;;  %v3306_v60 = vld [vmem:[%s4456_s5 + $0xc0] sm:$0xff] }
 0x32a   : > { %3584 = vmatpush3.xpose.msk.msra.mxu1 %vm359_vm1, %v952_v63  ;;  %3602 = vmatmul.mubr.msk.f32.vlgmr.msra.gmra.mxu0 %vm446_vm2, %v4010_v42  ;;  %v3301_v63 = vld [vmem:[%s4456_s5 + $0x50] sm:$0xff] }
 0x32b   : > { %3615 = vmatprep.subr.mxu0 %v3825_v2  ;;  %3623 = vmatprep.mubr.msk.f32.mxu0 %vm3826_vm0, %v3825_v2 }
 0x32c   : > { %3616 = vmatpush3.msra.mxu0 %v3289_v1  ;;  %3588 = vmatprep.subr.mxu1 %v3825_v2  ;;  %v3300_v1 = vld [vmem:[%s4456_s5 + $0x48] sm:$0xff] }
 0x32d   : > { %3617 = vmatprep.subr.mxu0 %v3825_v2  ;;  %3586 = vmatmul.mubr.msk.f32.vlgmr.msra.gmra.mxu1 %vm359_vm1, %v866_v3 }
 0x32e   : > { %3618 = vmatpush3.msra.mxu0 %v3288_v4  ;;  %3590 = vmatprep.mubr.msk.f32.mxu1 %vm3826_vm0, %v3825_v2  ;;  %v3299_v4 = vld [vmem:[%s4456_s5 + $0x40] sm:$0xff] }
 0x32f   : > { %3619 = vmatprep.subr.mxu0 %v3825_v2 }
 0x330   : > { %3620 = vmatpush3.msra.mxu0 %v3287_v5 }
 0x331   : > { %3621 = vmatprep.subr.mxu0 %v3825_v2 }
 0x332   : > { %3622 = vmatpush3.msra.mxu0 %v3286_v6  ;;  %v3316_v6 = vld [vmem:[%s4456_s5 + $0x158] sm:$0xff] }
 0x333   : > { %3624 = vmatmul.mubr.msk.f32.vlgmr.msra.gmra.mxu0 %vm446_vm2, %v4050_v52  ;;  %3636 = vmatprep.subr.mxu0 %v3825_v2 }
 0x334   : > { %3638 = vmatprep.mubr.msk.f32.mxu0 %vm3826_vm0, %v3825_v2  ;;  %3637 = vmatpush3.msra.mxu0 %v3296_v51 }
 0x335   : > { %3646 = vmatprep.subr.mxu0 %v3825_v2 }
 0x3e2   : > { %v1037_v8 = vpop.f32.mrf.mxu0 }
 0x3e3   : > { %v1038_v9 = vadd.f32 %v3267_v7, %v1037_v8  ;;  %v3315_v7 = vld [vmem:[%s4456_s5 + $0x150] sm:$0xff]  ;;  %v3311_v8 = vld [vmem:[%s4457_s6 + $0x6] ss:$0 sm:$0xff] }
 0x3e4   : > { %v3582_v10 = vpop.f32.mrf.mxu0 }
 0x3e5   : > { %3589 = vmatpush3.msra.mxu1 %v1038_v9  ;;  %v3314_v9 = vld [vmem:[%s4456_s5 + $0x148] sm:$0xff] }
 0x3e6   : > { %3604 = vmatprep.subr.mxu1 %v3825_v2 }
 0x3ea   : > { %v1281_v11 = vpop.f32.mrf.mxu0 }
 0x3eb   : > { %v1282_v39 = vadd.f32 %v3277_v35, %v1281_v11 }
 0x3ec   : > { %v3603_v12 = vpop.f32.mrf.mxu0 }
 0x3ed   : > { %v1113_v13 = vpop.f32.mrf.mxu1  ;;  %v3313_v12 = vld [vmem:[%s4456_s5 + $0x140] sm:$0xff] }
 0x3ee   : > { %v1117_v14 = vsel %vm359_vm1, %v1113_v13, -inf }
 0x3ef   : > { %1118 = vmax.xlane.f32.xlu0 %v1117_v14  ;;  %v3587_v15 = vpop.f32.mrf.mxu1 }
 0x3f3   : > { %v1447_v16 = vpop.f32.mrf.mxu0 }
 0x3f4   : > { %v1448_v40 = vadd.f32 %v3291_v37, %v1447_v16  ;;  %v3304_v16 = vld [vmem:[%s4457_s6 + $0x2] ss:$0 sm:$0xff]  ;;  %v3328_v37 = vld [vmem:[%s4456_s5 + $0x78] sm:$0xff] }
 0x3f5   : > { %v3625_v17 = vpop.f32.mrf.mxu0 }
 0x478   : > { %v1119_v18 = vpop.xlane.xlu0 %1118 }
 0x479   : > { %v1120_v19 = vsub.f32 %v1113_v13, %v1119_v18 }
 0x47b   : > { %v1121_v20 = vmul.f32 1.442695, %v1120_v19 }
 0x47d   : > { %3801 = vpow2.f32 %v1121_v20  ;;  %v3318_v20 = vld [vmem:[%s4457_s6 + $0xa] ss:$0 sm:$0xff] }
 0x48a   : > { %v3802_v21 = vpop.eup %3801 }
 0x48b   : > { %v1123_v22 = vsel %vm359_vm1, %v3802_v21, 0.0 }
 0x48c   : > { %1124 = vadd.xlane.f32.xlu0 %v1123_v22 }
 0x515   : > { %v1125_v23 = vpop.xlane.xlu0 %1124 }
 0x516   : > { %3803 = vrcp.f32 %v1125_v23 }
 0x523   : > { %v3804_v25 = vpop.eup %3803 }
 0x524   : > { %v1127_v26 = vmul.f32 %v3804_v25, %v3802_v21 }
 0x526   : > { %3591 = vmatmul.mubr.msk.f32.vlgmr.msra.gmra.mxu1 %vm359_vm1, %v1127_v26 }
 0x527   : > { %3605 = vmatpush3.msra.mxu1 %v3282_v27  ;;  %3612 = vmatprep.mubr.msk.f32.mxu1 %vm3826_vm0, %v3825_v2 }
 0x528   : > { %3606 = vmatprep.subr.mxu1 %v3825_v2 }
 0x529   : > { %3607 = vmatpush3.msra.mxu1 %v3281_v28 }
 0x52a   : > { %3608 = vmatprep.subr.mxu1 %v3825_v2 }
 0x52b   : > { %3609 = vmatpush3.msra.mxu1 %v3280_v29 }
 0x52c   : > { %3610 = vmatprep.subr.mxu1 %v3825_v2 }
 0x52d   : > { %3611 = vmatpush3.msra.mxu1 %v3279_v30 }
 0x52e   : > { %3613 = vmatmul.mubr.msk.f32.vlgmr.msra.gmra.mxu1 %vm446_vm2, %v4018_v45  ;;  %3626 = vmatprep.subr.mxu1 %v3825_v2 }
 0x52f   : > { %3628 = vmatprep.mubr.msk.f32.mxu1 %vm3826_vm0, %v3825_v2 }
 0x5e6   : > { %v1197_v31 = vpop.f32.mrf.mxu1 }
 0x5e8   : > { %v3592_v32 = vpop.f32.mrf.mxu1 }
 0x5ee   : > { %v1364_v34 = vpop.f32.mrf.mxu1 }
 0x5ef   : > { %v1365_v36 = vadd.f32 %v3284_v33, %v1364_v34  ;;  %v3323_v33 = vld [vmem:[%s4458_s7 + $0x10] sm:$0xff] }
 0x5f0   : > { %v3614_v38 = vpop.f32.mrf.mxu1 }
 0x5f1   : > { %3627 = vmatpush3.xpose.msk.msra.mxu1 %vm359_vm1, %v1365_v36  ;;  %v3327_v38 = vld [vmem:[%s4456_s5 + $0x70] sm:$0xff] }
 0x5f2   : > { %3631 = vmatprep.subr.mxu1 %v3825_v2 }
 0x5f4   : > { %3629 = vmatmul.mubr.msk.f32.vlgmr.msra.gmra.mxu1 %vm359_vm1, %v1282_v39  ;;  %v3326_v39 = vld [vmem:[%s4456_s5 + $0x68] sm:$0xff] }
 0x5f5   : > { %3632 = vmatpush3.msra.mxu1 %v1448_v40  ;;  %3633 = vmatprep.mubr.msk.f32.mxu1 %vm3826_vm0, %v3825_v2  ;;  %v3325_v40 = vld [vmem:[%s4456_s5 + $0x60] sm:$0xff] }
 0x5f6   : > { %3641 = vmatprep.subr.mxu1 %v3825_v2 }
 0x6b4   : > { %v1523_v41 = vpop.f32.mrf.mxu1 }
 0x6b5   : > { %v1527_v43 = vsel %vm359_vm1, %v1523_v41, -inf }
 0x6b6   : > { %1528 = vmax.xlane.f32.xlu1 %v1527_v43  ;;  %v3630_v44 = vpop.f32.mrf.mxu1  ;;  %v3341_v43 = vld [vmem:[%s4456_s5 + $0x170] sm:$0xff] }
 0x6b7   : > { %v3340_v44 = vld [vmem:[%s4456_s5 + $0x168] sm:$0xff] }
 0x73f   : > { %v1529_v46 = vpop.xlane.xlu1 %1528 }
 0x740   : > { %v1530_v47 = vsub.f32 %v1523_v41, %v1529_v46  ;;  %v3342_v41 = vld [vmem:[%s4456_s5 + $0x178] sm:$0xff] }
 0x741   : > { %v3335_v46 = vld [vmem:[%s4456_s5 + $0xf8] sm:$0xff] }
 0x742   : > { %v1531_v48 = vmul.f32 1.442695, %v1530_v47 }
 0x744   : > { %3805 = vpow2.f32 %v1531_v48  ;;  %v3334_v48 = vld [vmem:[%s4456_s5 + $0xf0] sm:$0xff] }
 0x751   : > { %v3806_v49 = vpop.eup %3805 }
 0x752   : > { %v1533_v50 = vsel %vm359_vm1, %v3806_v49, 0.0 }
 0x753   : > { %1534 = vadd.xlane.f32.xlu1 %v1533_v50  ;;  %v3332_v50 = vld [vmem:[%s4456_s5 + $0xe0] sm:$0xff] }
 0x7dc   : > { %v1535_v53 = vpop.xlane.xlu1 %1534 }
 0x7dd   : > { %3807 = vrcp.f32 %v1535_v53 }
 0x7ea   : > { %v3808_v54 = vpop.eup %3807 }
 0x7eb   : > { %v1537_v55 = vmul.f32 %v3808_v54, %v3806_v49 }
 0x7ed   : > { %3634 = vmatmul.mubr.msk.f32.vlgmr.msra.gmra.mxu1 %vm359_vm1, %v1537_v55 }
 0x7ee   : > { %3642 = vmatpush3.msra.mxu1 %v1201_v56  ;;  %3643 = vmatprep.mubr.msk.f32.mxu1 %vm3826_vm0, %v3825_v2 }
 0x7ef   : > { %3657 = vmatprep.subr.mxu1 %v3825_v2 }
 0x7f1   : > { %3644 = vmatmul.mubr.msk.f32.vlgmr.msra.gmra.mxu1 %vm359_vm1, %v1197_v31 }
 0x7f2   : > { %3658 = vmatpush3.msra.mxu1 %v3309_v57  ;;  %3665 = vmatprep.mubr.msk.f32.mxu1 %vm3826_vm0, %v3825_v2 }
 0x7f3   : > { %3659 = vmatprep.subr.mxu1 %v3825_v2 }
 0x7f4   : > { %3660 = vmatpush3.msra.mxu1 %v3308_v58 }
 0x7f5   : > { %3661 = vmatprep.subr.mxu1 %v3825_v2 }
 0x7f6   : > { %3662 = vmatpush3.msra.mxu1 %v3307_v59 }
 0x7f7   : > { %3663 = vmatprep.subr.mxu1 %v3825_v2 }
 0x7f8   : > { %3664 = vmatpush3.msra.mxu1 %v3306_v60  ;;  %v3337_v60 = vld [vmem:[%s4457_s6 + $0x7] ss:$0 sm:$0xff] }
 0x7f9   : > { %3666 = vmatmul.mubr.msk.f32.vlgmr.msra.gmra.mxu1 %vm446_vm2, %v4018_v45  ;;  %3679 = vmatprep.subr.mxu1 %v3825_v2 }
 0x7fa   : > { %3681 = vmatprep.mubr.msk.f32.mxu1 %vm3826_vm0, %v3825_v2 }
 0x8ad   : > { %v1607_v62 = vpop.f32.mrf.mxu1 }
 0x8ae   : > { %3639 = vmatmul.mubr.msk.f32.vlgmr.msra.gmra.mxu0 %vm359_vm1, %v1607_v62 }
 0x8af   : > { %3647 = vmatpush3.msra.mxu0 %v3302_v61  ;;  %v3635_v0 = vpop.f32.mrf.mxu1  ;;  %3654 = vmatprep.mubr.msk.f32.mxu0 %vm3826_vm0, %v3825_v2 }
 0x8b0   : > { %3648 = vmatprep.subr.mxu0 %v3825_v2 }
 0x8b1   : > { %3649 = vmatpush3.msra.mxu0 %v3301_v63  ;;  %v4200_v3 = vpop.f32.mrf.mxu1  ;;  %v3344_v63 = vld [vmem:[%s4457_s6 + $0xb] ss:$0 sm:$0xff] }
 0x8b2   : > { %3650 = vmatprep.subr.mxu0 %v3825_v2 }
 0x8b3   : > { %3651 = vmatpush3.msra.mxu0 %v3300_v1  ;;  %v3645_v5 = vpop.f32.mrf.mxu1 }
 0x8b4   : > { %3652 = vmatprep.subr.mxu0 %v3825_v2 }
 0x8b5   : > { %3653 = vmatpush3.msra.mxu0 %v3299_v4 }
 0x8b6   : > { %3655 = vmatmul.mubr.msk.f32.vlgmr.msra.gmra.mxu0 %vm446_vm2, %v4010_v42  ;;  %3668 = vmatprep.subr.mxu0 %v3825_v2 }
 0x8b7   : > { %3669 = vmatpush3.msra.mxu0 %v3316_v6  ;;  %3676 = vmatprep.mubr.msk.f32.mxu0 %vm3826_vm0, %v3825_v2 }
 0x8b8   : > { %3670 = vmatprep.subr.mxu0 %v3825_v2 }
 0x8b9   : > { %v1921_v10 = vpop.f32.mrf.mxu1  ;;  %3671 = vmatpush3.msra.mxu0 %v3315_v7 }
 0x8ba   : > { %v1922_v11 = vadd.f32 %v3311_v8, %v1921_v10  ;;  %3672 = vmatprep.subr.mxu0 %v3825_v2 }
 0x8bb   : > { %v3667_v13 = vpop.f32.mrf.mxu1  ;;  %3673 = vmatpush3.msra.mxu0 %v3314_v9 }
 0x8bc   : > { %3674 = vmatprep.subr.mxu0 %v3825_v2  ;;  %3680 = vmatpush3.xpose.msk.msra.mxu1 %vm359_vm1, %v1922_v11 }
 0x8bd   : > { %3675 = vmatpush3.msra.mxu0 %v3313_v12  ;;  %3684 = vmatprep.subr.mxu1 %v3825_v2  ;;  %v3349_v12 = vld [vmem:[%s4458_s7 + $0x18] sm:$0xff] }
 0x8be   : > { %3677 = vmatmul.mubr.msk.f32.vlgmr.msra.gmra.mxu0 %vm446_vm2, %v4050_v52  ;;  %3689 = vmatprep.subr.mxu0 %v3825_v2 }
 0x8bf   : > { %3691 = vmatprep.mubr.msk.f32.mxu0 %vm3826_vm0, %v3825_v2  ;;  %3690 = vmatpush3.msra.mxu0 %v3323_v33  ;;  %v3362_v33 = vld [vmem:[%s4454_s3 + $0x80] sm:$0xff] }
 0x8c0   : > { %3705 = vmatprep.subr.mxu0 %v3825_v2 }
 0x96e   : > { %v4237_v14 = vpop.f32.mrf.mxu0 }
 0x96f   : > { %v1756_v56 = vadd.f32 %v4200_v3, %v4237_v14 }
 0x970   : > { %v3640_v15 = vpop.f32.mrf.mxu0 }
 0x976   : > { %v1838_v17 = vpop.f32.mrf.mxu0 }
 0x977   : > { %v1839_v18 = vadd.f32 %v3304_v16, %v1838_v17  ;;  %v3356_v16 = vld [vmem:[%s4454_s3 + $0x78] sm:$0xff] }
 0x978   : > { %v3656_v19 = vpop.f32.mrf.mxu0 }
 0x979   : > { %3682 = vmatmul.mubr.msk.f32.vlgmr.msra.gmra.mxu1 %vm359_vm1, %v1839_v18  ;;  %v3355_v19 = vld [vmem:[%s4454_s3 + $0x70] sm:$0xff] }
 0x97a   : > { %3686 = vmatprep.mubr.msk.f32.mxu1 %vm3826_vm0, %v3825_v2 }
 0x97e   : > { %v2004_v21 = vpop.f32.mrf.mxu0 }
 0x97f   : > { %v2005_v22 = vadd.f32 %v3318_v20, %v2004_v21  ;;  %v3357_v20 = vld [vmem:[%s4453_s2 + $0x10] sm:$0xff]  ;;  %v3354_v21 = vld [vmem:[%s4454_s3 + $0x68] sm:$0xff] }
 0x980   : > { %v3678_v23 = vpop.f32.mrf.mxu0 }
 0x981   : > { %3685 = vmatpush3.msra.mxu1 %v2005_v22  ;;  %v3353_v22 = vld [vmem:[%s4454_s3 + $0x60] sm:$0xff] }
 0x982   : > { %3694 = vmatprep.subr.mxu1 %v3825_v2 }
 0xa39   : > { %v2080_v25 = vpop.f32.mrf.mxu1 }
 0xa3a   : > { %v2084_v26 = vsel %vm359_vm1, %v2080_v25, -inf }
 0xa3b   : > { %2085 = vmax.xlane.f32.xlu0 %v2084_v26  ;;  %v3683_v27 = vpop.f32.mrf.mxu1 }
 0xac4   : > { %v2086_v28 = vpop.xlane.xlu0 %2085 }
 0xac5   : > { %v2087_v29 = vsub.f32 %v2080_v25, %v2086_v28  ;;  %v3352_v25 = vld [vmem:[%s4455_s4 + $0x8] ss:$0 sm:$0xff] }
 0xac7   : > { %v2088_v30 = vmul.f32 1.442695, %v2087_v29  ;;  %v3365_v29 = vld [vmem:[%s4454_s3 + $0x98] sm:$0xff] }
 0xac9   : > { %3809 = vpow2.f32 %v2088_v30 }
 0xad6   : > { %v3810_v31 = vpop.eup %3809 }
 0xad7   : > { %v2090_v32 = vsel %vm359_vm1, %v3810_v31, 0.0 }
 0xad8   : > { %2091 = vadd.xlane.f32.xlu1 %v2090_v32  ;;  %v3363_v32 = vld [vmem:[%s4454_s3 + $0x88] sm:$0xff] }
 0xb61   : > { %v2092_v34 = vpop.xlane.xlu1 %2091 }
 0xb62   : > { %3811 = vrcp.f32 %v2092_v34  ;;  %v3372_v34 = vld [vmem:[%s4454_s3 + $0xb8] sm:$0xff] }
 0xb6f   : > { %v3812_v35 = vpop.eup %3811 }
 0xb70   : > { %v2094_v36 = vmul.f32 %v3812_v35, %v3810_v31  ;;  %v3364_v31 = vld [vmem:[%s4454_s3 + $0x90] sm:$0xff] }
 0xb72   : > { %3687 = vmatmul.mubr.msk.f32.vlgmr.msra.gmra.mxu1 %vm359_vm1, %v2094_v36  ;;  %v3361_v36 = vld [vmem:[%s4455_s4 + $0x5] ss:$0 sm:$0xff] }
 0xb73   : > { %3695 = vmatpush3.msra.mxu1 %v3328_v37  ;;  %3702 = vmatprep.mubr.msk.f32.mxu1 %vm3826_vm0, %v3825_v2 }
 0xb74   : > { %3696 = vmatprep.subr.mxu1 %v3825_v2 }
 0xb75   : > { %3697 = vmatpush3.msra.mxu1 %v3327_v38 }
 0xb76   : > { %3698 = vmatprep.subr.mxu1 %v3825_v2 }
 0xb77   : > { %3699 = vmatpush3.msra.mxu1 %v3326_v39 }
 0xb78   : > { %3700 = vmatprep.subr.mxu1 %v3825_v2 }
 0xb79   : > { %3701 = vmatpush3.msra.mxu1 %v3325_v40 }
 0xb7a   : > { %3703 = vmatmul.mubr.msk.f32.vlgmr.msra.gmra.mxu1 %vm446_vm2, %v4010_v42  ;;  %3716 = vmatprep.subr.mxu1 %v3825_v2  ;;  %v3339_v42 = vld [vmem:[%s4456_s5 + $0x160] sm:$0xff] }
 0xb7b   : > { %3717 = vmatpush3.msra.mxu1 %v3342_v41  ;;  %3724 = vmatprep.mubr.msk.f32.mxu1 %vm3826_vm0, %v3825_v2  ;;  %v3371_v41 = vld [vmem:[%s4454_s3 + $0xb0] sm:$0xff] }
 0xb7c   : > { %3718 = vmatprep.subr.mxu1 %v3825_v2 }
 0xb7d   : > { %3719 = vmatpush3.msra.mxu1 %v3341_v43  ;;  %v3370_v43 = vld [vmem:[%s4454_s3 + $0xa8] sm:$0xff] }
 0xb7e   : > { %3720 = vmatprep.subr.mxu1 %v3825_v2 }
 0xb7f   : > { %3721 = vmatpush3.msra.mxu1 %v3340_v44  ;;  %v3369_v44 = vld [vmem:[%s4454_s3 + $0xa0] sm:$0xff] }
 0xb80   : > { %3722 = vmatprep.subr.mxu1 %v3825_v2 }
 0xb81   : > { %3723 = vmatpush3.msra.mxu1 %v3339_v42  ;;  %v3075_v42 = vld [vmem:[%s4459_s8 + $0x18] sm:$0xff] }
 0xb82   : > { %3725 = vmatmul.mubr.msk.f32.vlgmr.msra.gmra.mxu1 %vm446_vm2, %v4050_v52  ;;  %3737 = vmatprep.subr.mxu1 %v3825_v2  ;;  %v3333_v52 = vld [vmem:[%s4456_s5 + $0xe8] sm:$0xff] }
 0xb83   : > { %3739 = vmatprep.mubr.msk.f32.mxu1 %vm3826_vm0, %v3825_v2  ;;  %3738 = vmatpush3.msra.mxu1 %v3349_v12 }
 0xb84   : > { %3747 = vmatprep.subr.mxu1 %v3825_v2 }
 0xc32   : > { %v2164_v47 = vpop.f32.mrf.mxu1 }
 0xc33   : > { %3692 = vmatmul.mubr.msk.f32.vlgmr.msra.gmra.mxu0 %vm359_vm1, %v2164_v47 }
 0xc34   : > { %3706 = vmatpush3.msra.mxu0 %v3335_v46  ;;  %v3688_v49 = vpop.f32.mrf.mxu1  ;;  %3713 = vmatprep.mubr.msk.f32.mxu0 %vm3826_vm0, %v3825_v2  ;;  %v3367_v46 = vld [vmem:[%s4455_s4 + $0x6] ss:$0 sm:$0xff] }
 0xc35   : > { %3707 = vmatprep.subr.mxu0 %v3825_v2 }
 0xc36   : > { %3708 = vmatpush3.msra.mxu0 %v3334_v48 }
 0xc37   : > { %3709 = vmatprep.subr.mxu0 %v3825_v2 }
 0xc38   : > { %3710 = vmatpush3.msra.mxu0 %v3333_v52 }
 0xc39   : > { %3711 = vmatprep.subr.mxu0 %v3825_v2 }
 0xc3a   : > { %v2323_v51 = vpop.f32.mrf.mxu1  ;;  %3712 = vmatpush3.msra.mxu0 %v3332_v50  ;;  %v3074_v50 = vld [vmem:[%s4459_s8 + $0x10] sm:$0xff] }
 0xc3b   : > { %3714 = vmatmul.mubr.msk.f32.vlgmr.msra.gmra.mxu0 %vm446_vm2, %v4018_v45  ;;  %3727 = vmatprep.subr.mxu0 %v3825_v2  ;;  %v3330_v45 = vld [vmem:[%s4457_s6 + $0x3] ss:$0 sm:$0xff] }
 0xc3c   : > { %v3704_v53 = vpop.f32.mrf.mxu1  ;;  %3729 = vmatprep.mubr.msk.f32.mxu0 %vm3826_vm0, %v3825_v2  ;;  %v2324_v1 = vadd.f32 %v3330_v45, %v2323_v51  ;;  %v3073_v51 = vld [vmem:[%s4459_s8 + $0x8] sm:$0xff] }
 0xc3d   : > { %v3072_v53 = vld [vmem:[%s4459_s8] sm:$0xff] }
 0xc42   : > { %v2489_v54 = vpop.f32.mrf.mxu1 }
 0xc43   : > { %v2490_v3 = vadd.f32 %v3344_v63, %v2489_v54  ;;  %v3374_v54 = vld [vmem:[%s4455_s4 + $0x7] ss:$0 sm:$0xff] }
 0xc44   : > { %v3726_v55 = vpop.f32.mrf.mxu1 }
 0xcf3   : > { %v2239_v57 = vpop.f32.mrf.mxu0 }
 0xcf4   : > { %v2243_v58 = vadd.f32 %v2239_v57, %v1756_v56 }
 0xcf5   : > { %v3693_v59 = vpop.f32.mrf.mxu0 }
 0xcf6   : > { %v3376_v59 = vld [vmem:[%s4459_s8 + $0x20] ss:$0 sm:$0xff] }
 0xcfb   : > { %v2406_v61 = vpop.f32.mrf.mxu0 }
 0xcfc   : > { %v2407_v62 = vadd.f32 %v3337_v60, %v2406_v61 }
 0xcfd   : > { %v3715_v0 = vpop.f32.mrf.mxu0 }
 0xcfe   : > { %3728 = vmatpush3.xpose.msk.msra.mxu0 %vm359_vm1, %v2407_v62 }
 0xcff   : > { %3732 = vmatprep.subr.mxu0 %v3825_v2 }
 0xd01   : > { %3730 = vmatmul.mubr.msk.f32.vlgmr.msra.gmra.mxu0 %vm359_vm1, %v2324_v1 }
 0xd02   : > { %3733 = vmatpush3.msra.mxu0 %v2490_v3  ;;  %3734 = vmatprep.mubr.msk.f32.mxu0 %vm3826_vm0, %v3825_v2 }
 0xd03   : > { %3742 = vmatprep.subr.mxu0 %v3825_v2 }
 0xdc1   : > { %v2565_v4 = vpop.f32.mrf.mxu0 }
 0xdc2   : > { %v2569_v5 = vsel %vm359_vm1, %v2565_v4, -inf }
 0xdc3   : > { %2570 = vmax.xlane.f32.xlu0 %v2569_v5  ;;  %v3731_v6 = vpop.f32.mrf.mxu0 }
 0xe4c   : > { %v2571_v7 = vpop.xlane.xlu0 %2570 }
 0xe4d   : > { %v2572_v8 = vsub.f32 %v2565_v4, %v2571_v7 }
 0xe4f   : > { %v2573_v9 = vmul.f32 1.442695, %v2572_v8 }
 0xe51   : > { %3813 = vpow2.f32 %v2573_v9 }
 0xe5e   : > { %v3814_v10 = vpop.eup %3813 }
 0xe5f   : > { %v2575_v11 = vsel %vm359_vm1, %v3814_v10, 0.0 }
 0xe60   : > { %2576 = vadd.xlane.f32.xlu1 %v2575_v11 }
 0xee9   : > { %v2577_v13 = vpop.xlane.xlu1 %2576 }
 0xeea   : > { %3815 = vrcp.f32 %v2577_v13 }
 0xef7   : > { %v3816_v14 = vpop.eup %3815 }
 0xef8   : > { %v2579_v15 = vmul.f32 %v3816_v14, %v3814_v10 }
 0xefa   : > { %3735 = vmatmul.mubr.msk.f32.vlgmr.msra.gmra.mxu0 %vm359_vm1, %v2579_v15 }
 0xefb   : > { %3744 = vmatprep.mubr.msk.f32.mxu0 %vm3826_vm0, %v3825_v2  ;;  %3743 = vmatpush3.msra.mxu0 %v3357_v20 }
 0xefc   : > { %3758 = vmatprep.subr.mxu0 %v3825_v2 }
 0xefe   : > { %3745 = vmatmul.mubr.msk.f32.vlgmr.msra.gmra.mxu0 %vm359_vm1, %v3961_v24 }
 0xeff   : > { %3766 = vmatprep.mubr.msk.f32.mxu0 %vm3826_vm0, %v3825_v2  ;;  %3759 = vmatpush3.msra.mxu0 %v3365_v29 }
 0xf00   : > { %3760 = vmatprep.subr.mxu0 %v3825_v2 }
 0xf01   : > { %3761 = vmatpush3.msra.mxu0 %v3364_v31 }
 0xf02   : > { %3762 = vmatprep.subr.mxu0 %v3825_v2 }
 0xf03   : > { %3763 = vmatpush3.msra.mxu0 %v3363_v32 }
 0xf04   : > { %3764 = vmatprep.subr.mxu0 %v3825_v2 }
 0xf05   : > { %3765 = vmatpush3.msra.mxu0 %v3362_v33 }
 0xf06   : > { %3780 = vmatprep.subr.mxu0 %v3825_v2 }
 0xfba   : > { %v2649_v17 = vpop.f32.mrf.mxu0 }
 0xfbb   : > { %3740 = vmatmul.mubr.msk.f32.vlgmr.msra.gmra.mxu1 %vm359_vm1, %v2649_v17 }
 0xfbc   : > { %v3736_v18 = vpop.f32.mrf.mxu0  ;;  %3748 = vmatpush3.msra.mxu1 %v3356_v16  ;;  %3755 = vmatprep.mubr.msk.f32.mxu1 %vm3826_vm0, %v3825_v2 }
 0xfbd   : > { %3749 = vmatprep.subr.mxu1 %v3825_v2 }
 0xfbe   : > { %3750 = vmatpush3.msra.mxu1 %v3355_v19  ;;  %v2811_v28 = vpop.f32.mrf.mxu0 }
 0xfbf   : > { %3751 = vmatprep.subr.mxu1 %v3825_v2 }
 0xfc0   : > { %3752 = vmatpush3.msra.mxu1 %v3354_v21  ;;  %v3746_v30 = vpop.f32.mrf.mxu0 }
 0xfc1   : > { %3753 = vmatprep.subr.mxu1 %v3825_v2 }
 0xfc2   : > { %3754 = vmatpush3.msra.mxu1 %v3353_v22 }
 0xfc3   : > { %3769 = vmatprep.subr.mxu1 %v3825_v2 }
0x107b   : > { %v2724_v23 = vpop.f32.mrf.mxu1 }
0x107c   : > { %v2728_v26 = vadd.f32 %v2724_v23, %v2243_v58 }
0x107d   : > { %v3741_v27 = vpop.f32.mrf.mxu1 }
0x107e   : > { %v2737_v24 = vadd.f32 %v3352_v25, %v2728_v26 }
0x1080   : > { %3756 = vmatmul.mubr.msk.f32.vlgmr.msra.gmra.mxu1 %vm446_vm2, %v2737_v24 }
0x1081   : > { %3777 = vmatprep.mubr.msk.f32.mxu1 %vm3826_vm0, %v3825_v2  ;;  %3770 = vmatpush3.msra.mxu1 %v3372_v34 }
0x1082   : > { %3771 = vmatprep.subr.mxu1 %v3825_v2 }
0x1083   : > { %3772 = vmatpush3.msra.mxu1 %v3371_v41 }
0x1084   : > { %3773 = vmatprep.subr.mxu1 %v3825_v2 }
0x1085   : > { %3774 = vmatpush3.msra.mxu1 %v3370_v43 }
0x1086   : > { %3775 = vmatprep.subr.mxu1 %v3825_v2 }
0x1087   : > { %3776 = vmatpush3.msra.mxu1 %v3369_v44 }
0x1140   : > { %v2884_v35 = vpop.f32.mrf.mxu1 }
0x1141   : > { %v2885_v37 = vadd.f32 %v2884_v35, %v2811_v28 }
0x1142   : > { %v3757_v38 = vpop.f32.mrf.mxu1 }
0x1143   : > { %v2896_v39 = vadd.f32 %v3361_v36, %v2885_v37 }
0x1145   : > { %v2897_v40 = vmax.f32 %v2896_v39, 0.0 }
0x1147   : > { %3767 = vmatmul.mubr.msk.f32.vlgmr.msra.gmra.mxu0 %vm446_vm2, %v2897_v40 }
0x1148   : > { %3788 = vmatprep.mubr.msk.f32.mxu0 %vm3826_vm0, %v3825_v2  ;;  %3781 = vmatpush3.msra.mxu0 %v3075_v42 }
0x1149   : > { %3782 = vmatprep.subr.mxu0 %v3825_v2 }
0x114a   : > { %3783 = vmatpush3.msra.mxu0 %v3074_v50 }
0x114b   : > { %3784 = vmatprep.subr.mxu0 %v3825_v2 }
0x114c   : > { %3785 = vmatpush3.msra.mxu0 %v3073_v51 }
0x114d   : > { %3786 = vmatprep.subr.mxu0 %v3825_v2 }
0x114e   : > { %3787 = vmatpush3.msra.mxu0 %v3072_v53 }
0x1207   : > { %v2980_v47 = vpop.f32.mrf.mxu0 }
0x1208   : > { %v2981_v48 = vadd.f32 %v3367_v46, %v2980_v47 }
0x1209   : > { %v3768_v49 = vpop.f32.mrf.mxu0 }
0x120a   : > { %v2984_v52 = vmax.f32 %v2981_v48, 0.0 }
0x120c   : > { %3778 = vmatmul.mubr.msk.f32.vlgmr.msra.gmra.mxu1 %vm446_vm2, %v2984_v52 }
0x12cc   : > { %v3067_v55 = vpop.f32.mrf.mxu1 }
0x12cd   : > { %v3068_v56 = vadd.f32 %v3374_v54, %v3067_v55 }
0x12ce   : > { %v3779_v57 = vpop.f32.mrf.mxu1 }
0x12cf   : > { %v3071_v58 = vmax.f32 %v3068_v56, 0.0 }
0x12d1   : > { %3789 = vmatmul.mubr.msk.f32.vlgmr.msra.gmra.mxu0 %vm446_vm2, %v3071_v58 }
0x1391   : > { %v3150_v2 = vpop.f32.mrf.mxu0 }
0x1392   : > { %v3151_v60 = vadd.f32 %v3376_v59, %v3150_v2 }
0x1393   : > { %v3790_v61 = vpop.f32.mrf.mxu0 }
0x1394   : > { %3154 = vst [vmem:[%s347_s14] sm:$0xff] %v3151_v60 }
0x1395 PF: > { %s19_s30 = sadd.s32 1, %s3823_s30  }
0x1396   : > { %p16_p4 = scmp.ge.s32.totalorder %s19_s30, 4  }
0x1398   :  { %18 = sbr.rel (!%p16_p4) target bundleno = 1 (0x1), region = 129 }

</bundles_post_ra>
